<compile_context>
chip_gen: v6e
topology: v6e:2x2x1
jax: 0.10.0
libtpu: 0.0.40
codegen_flags: <defaults>
</compile_context>

<pallas_src>
import functools
import math

import jax
import jax.numpy as jnp
from jax import lax
from jax.experimental import pallas as pl
from jax.experimental.pallas import tpu as pltpu

LN_EPS = 1e-12  # BERT LayerNorm eps


# --------------------------- in-kernel helpers ------------------------------

def _ln(x, g, b):
    mu = jnp.mean(x, axis=-1, keepdims=True)
    var = jnp.mean(jnp.square(x - mu), axis=-1, keepdims=True)
    return (x - mu) * lax.rsqrt(var + LN_EPS) * g + b


_ERF_P = 0.3275911
_ERF_A = (0.254829592, -0.284496736, 1.421413741, -1.453152027, 1.061405429)


def _erf(z):
    # Abramowitz & Stegun 7.1.26: |error| < 1.5e-7 -> effectively exact in f32.
    a1, a2, a3, a4, a5 = _ERF_A
    za = jnp.abs(z)
    t = 1.0 / (1.0 + _ERF_P * za)
    poly = ((((a5 * t + a4) * t + a3) * t + a2) * t + a1) * t
    y = 1.0 - poly * jnp.exp(-za * za)
    return jnp.where(z >= 0, y, -y)


def _gelu_exact(x):
    # Exact (erf) GELU as used by HF BERT (not the tanh approximation).
    return 0.5 * x * (1.0 + _erf(x * (1.0 / math.sqrt(2.0))))


# --------------------------- fused encoder kernel ---------------------------

def _encoder_kernel(ids_ref, wemb_ref, pos_ref, eg_ref, eb_ref,
                    wqkv_ref, bqkv_ref, wo_ref, bo_ref, ag_ref, ab_ref,
                    w1_ref, b1_ref, w2_ref, b2_ref, og_ref, ob_ref,
                    out_ref, *, n_layers, n_heads, vocab):
    """One grid step = one batch element.  Everything stays in VMEM."""
    s = ids_ref.shape[0]
    hidden = wemb_ref.shape[1]
    hd = hidden // n_heads
    scale = 1.0 / math.sqrt(hd)

    # Embedding gather as a one-hot matmul (vocab table fits in VMEM).
    ids = ids_ref[...]                                            # (S, 1) int32
    iota = lax.broadcasted_iota(jnp.int32, (s, vocab), 1)         # (S, V)
    onehot = jnp.where(ids == iota, 1.0, 0.0).astype(jnp.float32)
    x = jnp.dot(onehot, wemb_ref[...], preferred_element_type=jnp.float32)
    x = x + pos_ref[...]                                          # pos + type-0 emb
    x = _ln(x, eg_ref[...], eb_ref[...])

    for li in range(n_layers):
        # Fused QKV projection: one (S,H) @ (H,3H) matmul.
        qkv = jnp.dot(x, wqkv_ref[li], preferred_element_type=jnp.float32)
        qkv = qkv + bqkv_ref[li]
        q = qkv[:, 0:hidden]
        k = qkv[:, hidden:2 * hidden]
        v = qkv[:, 2 * hidden:3 * hidden]

        # Per-head attention (static unrolled loop; head slices stay in VMEM).
        head_ctx = []
        for h in range(n_heads):
            c0 = h * hd
            qh = q[:, c0:c0 + hd]
            kh = k[:, c0:c0 + hd]
            vh = v[:, c0:c0 + hd]
            # q @ k^T via dot_general contracting last dims (no explicit .T).
            sc = lax.dot_general(qh, kh, (((1,), (1,)), ((), ())),
                                 preferred_element_type=jnp.float32) * scale
            m = jnp.max(sc, axis=-1, keepdims=True)
            p = jnp.exp(sc - m)
            l = jnp.sum(p, axis=-1, keepdims=True)
            p = p * pl.reciprocal(l, approx=True)   # EUP reciprocal, off VALU path
            head_ctx.append(jnp.dot(p, vh, preferred_element_type=jnp.float32))
        ctx = jnp.concatenate(head_ctx, axis=1)                    # (S, H)

        attn_out = jnp.dot(ctx, wo_ref[li],
                           preferred_element_type=jnp.float32) + bo_ref[li]
        x = _ln(x + attn_out, ag_ref[li], ab_ref[li])

        ff = jnp.dot(x, w1_ref[li], preferred_element_type=jnp.float32) + b1_ref[li]
        ff = _gelu_exact(ff)
        ff = jnp.dot(ff, w2_ref[li], preferred_element_type=jnp.float32) + b2_ref[li]
        x = _ln(x + ff, og_ref[li], ob_ref[li])

    # CLS token (row 0 of this batch element's sequence).
    out_ref[0] = x[0:1, :]


# ------------------------------ model (glue) -------------------------------

def init_params(key, vocab, max_pos, hidden, n_layers, intermediate):
    def normal(k, shape):
        return 0.02 * jax.random.normal(k, shape, dtype=jnp.float32)

    keys = jax.random.split(key, 3 + n_layers)
    params = dict(
        word_emb=normal(keys[0], (vocab, hidden)),
        pos_emb=normal(keys[1], (max_pos, hidden)),
        type_emb=normal(keys[2], (2, hidden)),
        emb_ln_g=jnp.ones((hidden,), jnp.float32),
        emb_ln_b=jnp.zeros((hidden,), jnp.float32),
        layers=[],
    )
    for li in range(n_layers):
        lk = jax.random.split(keys[3 + li], 6)
        params["layers"].append(dict(
            wq=normal(lk[0], (hidden, hidden)), bq=jnp.zeros((hidden,), jnp.float32),
            wk=normal(lk[1], (hidden, hidden)), bk=jnp.zeros((hidden,), jnp.float32),
            wv=normal(lk[2], (hidden, hidden)), bv=jnp.zeros((hidden,), jnp.float32),
            wo=normal(lk[3], (hidden, hidden)), bo=jnp.zeros((hidden,), jnp.float32),
            attn_ln_g=jnp.ones((hidden,), jnp.float32),
            attn_ln_b=jnp.zeros((hidden,), jnp.float32),
            w1=normal(lk[4], (hidden, intermediate)),
            b1=jnp.zeros((intermediate,), jnp.float32),
            w2=normal(lk[5], (intermediate, hidden)),
            b2=jnp.zeros((hidden,), jnp.float32),
            out_ln_g=jnp.ones((hidden,), jnp.float32),
            out_ln_b=jnp.zeros((hidden,), jnp.float32),
        ))
    return params


def _replicated(arr):
    """Full-array block, same for every grid step (weights)."""
    zeros = (0,) * arr.ndim
    return pl.BlockSpec(arr.shape, lambda b: zeros)


def model_wrapper_forward(params, input_ids, n_heads):
    """Equivalent of ModelWrapper.forward: encoder(input_ids) -> last_hidden[:, 0, :]."""
    b, s = input_ids.shape
    vocab, hidden = params["word_emb"].shape
    n_layers = len(params["layers"])

    # --- weight preprocessing (pure layout work, done once per call) ---
    ids_col = input_ids.reshape(b * s, 1).astype(jnp.int32)
    pos_type = params["pos_emb"][:s] + params["type_emb"][0][None, :]   # (S, H)
    emb_g = params["emb_ln_g"].reshape(1, hidden)
    emb_b = params["emb_ln_b"].reshape(1, hidden)

    layers = params["layers"]

    def stack2(name):            # (L, 1, dim)
        return jnp.stack([l[name] for l in layers])[:, None, :]

    wqkv = jnp.stack([jnp.concatenate([l["wq"], l["wk"], l["wv"]], axis=1)
                      for l in layers])                                  # (L, H, 3H)
    bqkv = jnp.stack([jnp.concatenate([l["bq"], l["bk"], l["bv"]])[None, :]
                      for l in layers])                                  # (L, 1, 3H)
    wo = jnp.stack([l["wo"] for l in layers])                            # (L, H, H)
    bo = stack2("bo")
    ag = stack2("attn_ln_g")
    ab = stack2("attn_ln_b")
    w1 = jnp.stack([l["w1"] for l in layers])                            # (L, H, I)
    b1 = stack2("b1")
    w2 = jnp.stack([l["w2"] for l in layers])                            # (L, I, H)
    b2 = stack2("b2")
    og = stack2("out_ln_g")
    ob = stack2("out_ln_b")

    in_specs = [
        pl.BlockSpec((s, 1), lambda bb: (bb, 0)),    # input ids for this batch elem
        _replicated(params["word_emb"]),
        _replicated(pos_type),
        _replicated(emb_g), _replicated(emb_b),
        _replicated(wqkv), _replicated(bqkv),
        _replicated(wo), _replicated(bo),
        _replicated(ag), _replicated(ab),
        _replicated(w1), _replicated(b1),
        _replicated(w2), _replicated(b2),
        _replicated(og), _replicated(ob),
    ]
    out_spec = pl.BlockSpec((1, 1, hidden), lambda bb: (bb, 0, 0))

    out = pl.pallas_call(
        functools.partial(_encoder_kernel, n_layers=n_layers,
                          n_heads=n_heads, vocab=vocab),
        out_shape=jax.ShapeDtypeStruct((b, 1, hidden), jnp.float32),
        grid=(b,),
        in_specs=in_specs,
        out_specs=out_spec,
        compiler_params=pltpu.CompilerParams(
            dimension_semantics=("parallel",)),      # batch across TCs on v7x
    )(ids_col, params["word_emb"], pos_type, emb_g, emb_b,
      wqkv, bqkv, wo, bo, ag, ab, w1, b1, w2, b2, og, ob)

    return out[:, 0, :]   # (B, H) CLS hidden vectors
    # TODO(synk): no attention mask is applied (fixed-length synthetic input,
    # matches calling the HF model with input_ids only and no padding).


# ---------------------------------- main ------------------------------------

if __name__ == "__main__":
    B, S = 2, 8
    VOCAB, MAX_POS = 64, 16
    HIDDEN, N_HEADS, N_LAYERS, INTERMEDIATE = 32, 4, 2, 128

    key = jax.random.PRNGKey(0)
    k_params, k_ids = jax.random.split(key)
    params = init_params(k_params, VOCAB, MAX_POS, HIDDEN, N_LAYERS, INTERMEDIATE)
    input_ids = jax.random.randint(k_ids, (B, S), 0, VOCAB, dtype=jnp.int32)

    fwd = jax.jit(functools.partial(model_wrapper_forward, n_heads=N_HEADS))
    out = fwd(params, input_ids)
    jax.block_until_ready(out)

    assert out.shape == (B, HIDDEN) and out.dtype == jnp.float32
    print("KERNEL_OK")
</pallas_src>

<mosaic_0001>
module attributes {stable_mosaic.version = 11 : i64} {
  func.func @_encoder_kernel(%arg0: i32, %arg1: memref<8x1xi32, #tpu.memory_space<vmem>>, %arg2: memref<64x32xf32, #tpu.memory_space<vmem>>, %arg3: memref<8x32xf32, #tpu.memory_space<vmem>>, %arg4: memref<1x32xf32, #tpu.memory_space<vmem>>, %arg5: memref<1x32xf32, #tpu.memory_space<vmem>>, %arg6: memref<2x32x96xf32, #tpu.memory_space<vmem>>, %arg7: memref<2x1x96xf32, #tpu.memory_space<vmem>>, %arg8: memref<2x32x32xf32, #tpu.memory_space<vmem>>, %arg9: memref<2x1x32xf32, #tpu.memory_space<vmem>>, %arg10: memref<2x1x32xf32, #tpu.memory_space<vmem>>, %arg11: memref<2x1x32xf32, #tpu.memory_space<vmem>>, %arg12: memref<2x32x128xf32, #tpu.memory_space<vmem>>, %arg13: memref<2x1x128xf32, #tpu.memory_space<vmem>>, %arg14: memref<2x128x32xf32, #tpu.memory_space<vmem>>, %arg15: memref<2x1x32xf32, #tpu.memory_space<vmem>>, %arg16: memref<2x1x32xf32, #tpu.memory_space<vmem>>, %arg17: memref<2x1x32xf32, #tpu.memory_space<vmem>>, %arg18: memref<1x1x32xf32, #tpu.memory_space<vmem>>) attributes {dimension_semantics = [#tpu.dimension_semantics<parallel>], iteration_bounds = array<i64: 2>, scalar_prefetch = 0 : i64, scratch_operands = 0 : i64, tpu.core_type = #tpu.core_type<tc>, window_params = [{transform_indices = @transform_0, window_bounds = array<i64: 8, 1>}, {pipeline_mode = #tpu.pipeline_mode<synchronous>, transform_indices = @transform_1, window_bounds = array<i64: 64, 32>}, {pipeline_mode = #tpu.pipeline_mode<synchronous>, transform_indices = @transform_2, window_bounds = array<i64: 8, 32>}, {pipeline_mode = #tpu.pipeline_mode<synchronous>, transform_indices = @transform_3, window_bounds = array<i64: 1, 32>}, {pipeline_mode = #tpu.pipeline_mode<synchronous>, transform_indices = @transform_4, window_bounds = array<i64: 1, 32>}, {pipeline_mode = #tpu.pipeline_mode<synchronous>, transform_indices = @transform_5, window_bounds = array<i64: 2, 32, 96>}, {pipeline_mode = #tpu.pipeline_mode<synchronous>, transform_indices = @transform_6, window_bounds = array<i64: 2, 1, 96>}, {pipeline_mode = #tpu.pipeline_mode<synchronous>, transform_indices = @transform_7, window_bounds = array<i64: 2, 32, 32>}, {pipeline_mode = #tpu.pipeline_mode<synchronous>, transform_indices = @transform_8, window_bounds = array<i64: 2, 1, 32>}, {pipeline_mode = #tpu.pipeline_mode<synchronous>, transform_indices = @transform_9, window_bounds = array<i64: 2, 1, 32>}, {pipeline_mode = #tpu.pipeline_mode<synchronous>, transform_indices = @transform_10, window_bounds = array<i64: 2, 1, 32>}, {pipeline_mode = #tpu.pipeline_mode<synchronous>, transform_indices = @transform_11, window_bounds = array<i64: 2, 32, 128>}, {pipeline_mode = #tpu.pipeline_mode<synchronous>, transform_indices = @transform_12, window_bounds = array<i64: 2, 1, 128>}, {pipeline_mode = #tpu.pipeline_mode<synchronous>, transform_indices = @transform_13, window_bounds = array<i64: 2, 128, 32>}, {pipeline_mode = #tpu.pipeline_mode<synchronous>, transform_indices = @transform_14, window_bounds = array<i64: 2, 1, 32>}, {pipeline_mode = #tpu.pipeline_mode<synchronous>, transform_indices = @transform_15, window_bounds = array<i64: 2, 1, 32>}, {pipeline_mode = #tpu.pipeline_mode<synchronous>, transform_indices = @transform_16, window_bounds = array<i64: 2, 1, 32>}, {transform_indices = @transform_17, window_bounds = array<i64: 1, 1, 32>}]} {
    %c0 = arith.constant 0 : index
    %c0_0 = arith.constant 0 : index
    %0 = vector.load %arg1[%c0, %c0_0] : memref<8x1xi32, #tpu.memory_space<vmem>>, vector<8x1xi32>
    %1 = tpu.iota {dimensions = array<i32: 1>} : vector<8x64xi32>
    %2 = vector.broadcast %0 : vector<8x1xi32> to vector<8x64xi32>
    %3 = arith.cmpi eq, %2, %1 : vector<8x64xi32>
    %cst = arith.constant 1.000000e+00 : f32
    %cst_1 = arith.constant 0.000000e+00 : f32
    %4 = vector.broadcast %cst : f32 to vector<8x64xf32>
    %5 = vector.broadcast %cst_1 : f32 to vector<8x64xf32>
    %6 = arith.select %3, %4, %5 : vector<8x64xi1>, vector<8x64xf32>
    %c0_2 = arith.constant 0 : index
    %c0_3 = arith.constant 0 : index
    %7 = vector.load %arg2[%c0_2, %c0_3] : memref<64x32xf32, #tpu.memory_space<vmem>>, vector<64x32xf32>
    %cst_4 = arith.constant dense<0.000000e+00> : vector<8x32xf32>
    %8 = tpu.matmul %6, %7, %cst_4 {dimension_numbers = #tpu.dot_dimension_numbers<[1], [0], [0], [1], [0, 0, 1, 1], [], []>} : vector<8x64xf32>, vector<64x32xf32>, vector<8x32xf32> -> vector<8x32xf32>
    %c0_5 = arith.constant 0 : index
    %c0_6 = arith.constant 0 : index
    %9 = vector.load %arg3[%c0_5, %c0_6] : memref<8x32xf32, #tpu.memory_space<vmem>>, vector<8x32xf32>
    %10 = arith.addf %8, %9 : vector<8x32xf32>
    %c0_7 = arith.constant 0 : index
    %c0_8 = arith.constant 0 : index
    %11 = vector.load %arg4[%c0_7, %c0_8] : memref<1x32xf32, #tpu.memory_space<vmem>>, vector<1x32xf32>
    %c0_9 = arith.constant 0 : index
    %c0_10 = arith.constant 0 : index
    %12 = vector.load %arg5[%c0_9, %c0_10] : memref<1x32xf32, #tpu.memory_space<vmem>>, vector<1x32xf32>
    %cst_11 = arith.constant dense<0.000000e+00> : vector<8xf32>
    %13 = vector.multi_reduction <add>, %10, %cst_11 [1] : vector<8x32xf32> to vector<8xf32>
    %14 = vector.shape_cast %13 : vector<8xf32> to vector<8x1xf32>
    %cst_12 = arith.constant 3.200000e+01 : f32
    %15 = vector.broadcast %cst_12 : f32 to vector<8x1xf32>
    %16 = arith.divf %14, %15 : vector<8x1xf32>
    %17 = vector.broadcast %16 : vector<8x1xf32> to vector<8x32xf32>
    %18 = arith.subf %10, %17 : vector<8x32xf32>
    %19 = arith.mulf %18, %18 : vector<8x32xf32>
    %cst_13 = arith.constant dense<0.000000e+00> : vector<8xf32>
    %20 = vector.multi_reduction <add>, %19, %cst_13 [1] : vector<8x32xf32> to vector<8xf32>
    %21 = vector.shape_cast %20 : vector<8xf32> to vector<8x1xf32>
    %cst_14 = arith.constant 3.200000e+01 : f32
    %22 = vector.broadcast %cst_14 : f32 to vector<8x1xf32>
    %23 = arith.divf %21, %22 : vector<8x1xf32>
    %24 = vector.broadcast %16 : vector<8x1xf32> to vector<8x32xf32>
    %25 = arith.subf %10, %24 : vector<8x32xf32>
    %cst_15 = arith.constant 9.99999996E-13 : f32
    %26 = vector.broadcast %cst_15 : f32 to vector<8x1xf32>
    %27 = arith.addf %23, %26 : vector<8x1xf32>
    %28 = math.rsqrt %27 : vector<8x1xf32>
    %29 = vector.broadcast %28 : vector<8x1xf32> to vector<8x32xf32>
    %30 = arith.mulf %25, %29 : vector<8x32xf32>
    %31 = vector.broadcast %11 : vector<1x32xf32> to vector<8x32xf32>
    %32 = arith.mulf %30, %31 : vector<8x32xf32>
    %33 = vector.broadcast %12 : vector<1x32xf32> to vector<8x32xf32>
    %34 = arith.addf %32, %33 : vector<8x32xf32>
    %c0_16 = arith.constant 0 : index
    %c0_17 = arith.constant 0 : index
    %c0_18 = arith.constant 0 : index
    %35 = vector.load %arg6[%c0_16, %c0_17, %c0_18] : memref<2x32x96xf32, #tpu.memory_space<vmem>>, vector<1x32x96xf32>
    %36 = vector.shape_cast %35 : vector<1x32x96xf32> to vector<32x96xf32>
    %cst_19 = arith.constant dense<0.000000e+00> : vector<8x96xf32>
    %37 = tpu.matmul %34, %36, %cst_19 {dimension_numbers = #tpu.dot_dimension_numbers<[1], [0], [0], [1], [0, 0, 1, 1], [], []>} : vector<8x32xf32>, vector<32x96xf32>, vector<8x96xf32> -> vector<8x96xf32>
    %c0_20 = arith.constant 0 : index
    %c0_21 = arith.constant 0 : index
    %c0_22 = arith.constant 0 : index
    %38 = vector.load %arg7[%c0_20, %c0_21, %c0_22] : memref<2x1x96xf32, #tpu.memory_space<vmem>>, vector<1x1x96xf32>
    %39 = vector.shape_cast %38 : vector<1x1x96xf32> to vector<1x96xf32>
    %40 = vector.broadcast %39 : vector<1x96xf32> to vector<8x96xf32>
    %41 = arith.addf %37, %40 : vector<8x96xf32>
    %42 = vector.extract_strided_slice %41 {offsets = [0, 0], sizes = [8, 32], strides = [1, 1]} : vector<8x96xf32> to vector<8x32xf32>
    %43 = vector.extract_strided_slice %41 {offsets = [0, 32], sizes = [8, 32], strides = [1, 1]} : vector<8x96xf32> to vector<8x32xf32>
    %44 = vector.extract_strided_slice %41 {offsets = [0, 64], sizes = [8, 32], strides = [1, 1]} : vector<8x96xf32> to vector<8x32xf32>
    %45 = vector.extract_strided_slice %42 {offsets = [0, 0], sizes = [8, 8], strides = [1, 1]} : vector<8x32xf32> to vector<8x8xf32>
    %46 = vector.extract_strided_slice %43 {offsets = [0, 0], sizes = [8, 8], strides = [1, 1]} : vector<8x32xf32> to vector<8x8xf32>
    %47 = vector.extract_strided_slice %44 {offsets = [0, 0], sizes = [8, 8], strides = [1, 1]} : vector<8x32xf32> to vector<8x8xf32>
    %cst_23 = arith.constant dense<0.000000e+00> : vector<8x8xf32>
    %48 = tpu.matmul %45, %46, %cst_23 {dimension_numbers = #tpu.dot_dimension_numbers<[1], [1], [0], [0], [0, 0, 1, 0], [], []>} : vector<8x8xf32>, vector<8x8xf32>, vector<8x8xf32> -> vector<8x8xf32>
    %cst_24 = arith.constant 0.353553385 : f32
    %49 = vector.broadcast %cst_24 : f32 to vector<8x8xf32>
    %50 = arith.mulf %48, %49 : vector<8x8xf32>
    %cst_25 = arith.constant dense<0xFF800000> : vector<8xf32>
    %51 = vector.multi_reduction <maximumf>, %50, %cst_25 [1] : vector<8x8xf32> to vector<8xf32>
    %52 = vector.shape_cast %51 : vector<8xf32> to vector<8x1xf32>
    %53 = vector.broadcast %52 : vector<8x1xf32> to vector<8x8xf32>
    %54 = arith.subf %50, %53 : vector<8x8xf32>
    %55 = math.exp %54 : vector<8x8xf32>
    %cst_26 = arith.constant dense<0.000000e+00> : vector<8xf32>
    %56 = vector.multi_reduction <add>, %55, %cst_26 [1] : vector<8x8xf32> to vector<8xf32>
    %57 = vector.shape_cast %56 : vector<8xf32> to vector<8x1xf32>
    %58 = tpu.reciprocal %57 {approx = true} : vector<8x1xf32> -> vector<8x1xf32>
    %59 = vector.broadcast %58 : vector<8x1xf32> to vector<8x8xf32>
    %60 = arith.mulf %55, %59 : vector<8x8xf32>
    %cst_27 = arith.constant dense<0.000000e+00> : vector<8x8xf32>
    %61 = tpu.matmul %60, %47, %cst_27 {dimension_numbers = #tpu.dot_dimension_numbers<[1], [0], [0], [1], [0, 0, 1, 1], [], []>} : vector<8x8xf32>, vector<8x8xf32>, vector<8x8xf32> -> vector<8x8xf32>
    %62 = vector.extract_strided_slice %42 {offsets = [0, 8], sizes = [8, 8], strides = [1, 1]} : vector<8x32xf32> to vector<8x8xf32>
    %63 = vector.extract_strided_slice %43 {offsets = [0, 8], sizes = [8, 8], strides = [1, 1]} : vector<8x32xf32> to vector<8x8xf32>
    %64 = vector.extract_strided_slice %44 {offsets = [0, 8], sizes = [8, 8], strides = [1, 1]} : vector<8x32xf32> to vector<8x8xf32>
    %cst_28 = arith.constant dense<0.000000e+00> : vector<8x8xf32>
    %65 = tpu.matmul %62, %63, %cst_28 {dimension_numbers = #tpu.dot_dimension_numbers<[1], [1], [0], [0], [0, 0, 1, 0], [], []>} : vector<8x8xf32>, vector<8x8xf32>, vector<8x8xf32> -> vector<8x8xf32>
    %cst_29 = arith.constant 0.353553385 : f32
    %66 = vector.broadcast %cst_29 : f32 to vector<8x8xf32>
    %67 = arith.mulf %65, %66 : vector<8x8xf32>
    %cst_30 = arith.constant dense<0xFF800000> : vector<8xf32>
    %68 = vector.multi_reduction <maximumf>, %67, %cst_30 [1] : vector<8x8xf32> to vector<8xf32>
    %69 = vector.shape_cast %68 : vector<8xf32> to vector<8x1xf32>
    %70 = vector.broadcast %69 : vector<8x1xf32> to vector<8x8xf32>
    %71 = arith.subf %67, %70 : vector<8x8xf32>
    %72 = math.exp %71 : vector<8x8xf32>
    %cst_31 = arith.constant dense<0.000000e+00> : vector<8xf32>
    %73 = vector.multi_reduction <add>, %72, %cst_31 [1] : vector<8x8xf32> to vector<8xf32>
    %74 = vector.shape_cast %73 : vector<8xf32> to vector<8x1xf32>
    %75 = tpu.reciprocal %74 {approx = true} : vector<8x1xf32> -> vector<8x1xf32>
    %76 = vector.broadcast %75 : vector<8x1xf32> to vector<8x8xf32>
    %77 = arith.mulf %72, %76 : vector<8x8xf32>
    %cst_32 = arith.constant dense<0.000000e+00> : vector<8x8xf32>
    %78 = tpu.matmul %77, %64, %cst_32 {dimension_numbers = #tpu.dot_dimension_numbers<[1], [0], [0], [1], [0, 0, 1, 1], [], []>} : vector<8x8xf32>, vector<8x8xf32>, vector<8x8xf32> -> vector<8x8xf32>
    %79 = vector.extract_strided_slice %42 {offsets = [0, 16], sizes = [8, 8], strides = [1, 1]} : vector<8x32xf32> to vector<8x8xf32>
    %80 = vector.extract_strided_slice %43 {offsets = [0, 16], sizes = [8, 8], strides = [1, 1]} : vector<8x32xf32> to vector<8x8xf32>
    %81 = vector.extract_strided_slice %44 {offsets = [0, 16], sizes = [8, 8], strides = [1, 1]} : vector<8x32xf32> to vector<8x8xf32>
    %cst_33 = arith.constant dense<0.000000e+00> : vector<8x8xf32>
    %82 = tpu.matmul %79, %80, %cst_33 {dimension_numbers = #tpu.dot_dimension_numbers<[1], [1], [0], [0], [0, 0, 1, 0], [], []>} : vector<8x8xf32>, vector<8x8xf32>, vector<8x8xf32> -> vector<8x8xf32>
    %cst_34 = arith.constant 0.353553385 : f32
    %83 = vector.broadcast %cst_34 : f32 to vector<8x8xf32>
    %84 = arith.mulf %82, %83 : vector<8x8xf32>
    %cst_35 = arith.constant dense<0xFF800000> : vector<8xf32>
    %85 = vector.multi_reduction <maximumf>, %84, %cst_35 [1] : vector<8x8xf32> to vector<8xf32>
    %86 = vector.shape_cast %85 : vector<8xf32> to vector<8x1xf32>
    %87 = vector.broadcast %86 : vector<8x1xf32> to vector<8x8xf32>
    %88 = arith.subf %84, %87 : vector<8x8xf32>
    %89 = math.exp %88 : vector<8x8xf32>
    %cst_36 = arith.constant dense<0.000000e+00> : vector<8xf32>
    %90 = vector.multi_reduction <add>, %89, %cst_36 [1] : vector<8x8xf32> to vector<8xf32>
    %91 = vector.shape_cast %90 : vector<8xf32> to vector<8x1xf32>
    %92 = tpu.reciprocal %91 {approx = true} : vector<8x1xf32> -> vector<8x1xf32>
    %93 = vector.broadcast %92 : vector<8x1xf32> to vector<8x8xf32>
    %94 = arith.mulf %89, %93 : vector<8x8xf32>
    %cst_37 = arith.constant dense<0.000000e+00> : vector<8x8xf32>
    %95 = tpu.matmul %94, %81, %cst_37 {dimension_numbers = #tpu.dot_dimension_numbers<[1], [0], [0], [1], [0, 0, 1, 1], [], []>} : vector<8x8xf32>, vector<8x8xf32>, vector<8x8xf32> -> vector<8x8xf32>
    %96 = vector.extract_strided_slice %42 {offsets = [0, 24], sizes = [8, 8], strides = [1, 1]} : vector<8x32xf32> to vector<8x8xf32>
    %97 = vector.extract_strided_slice %43 {offsets = [0, 24], sizes = [8, 8], strides = [1, 1]} : vector<8x32xf32> to vector<8x8xf32>
    %98 = vector.extract_strided_slice %44 {offsets = [0, 24], sizes = [8, 8], strides = [1, 1]} : vector<8x32xf32> to vector<8x8xf32>
    %cst_38 = arith.constant dense<0.000000e+00> : vector<8x8xf32>
    %99 = tpu.matmul %96, %97, %cst_38 {dimension_numbers = #tpu.dot_dimension_numbers<[1], [1], [0], [0], [0, 0, 1, 0], [], []>} : vector<8x8xf32>, vector<8x8xf32>, vector<8x8xf32> -> vector<8x8xf32>
    %cst_39 = arith.constant 0.353553385 : f32
    %100 = vector.broadcast %cst_39 : f32 to vector<8x8xf32>
    %101 = arith.mulf %99, %100 : vector<8x8xf32>
    %cst_40 = arith.constant dense<0xFF800000> : vector<8xf32>
    %102 = vector.multi_reduction <maximumf>, %101, %cst_40 [1] : vector<8x8xf32> to vector<8xf32>
    %103 = vector.shape_cast %102 : vector<8xf32> to vector<8x1xf32>
    %104 = vector.broadcast %103 : vector<8x1xf32> to vector<8x8xf32>
    %105 = arith.subf %101, %104 : vector<8x8xf32>
    %106 = math.exp %105 : vector<8x8xf32>
    %cst_41 = arith.constant dense<0.000000e+00> : vector<8xf32>
    %107 = vector.multi_reduction <add>, %106, %cst_41 [1] : vector<8x8xf32> to vector<8xf32>
    %108 = vector.shape_cast %107 : vector<8xf32> to vector<8x1xf32>
    %109 = tpu.reciprocal %108 {approx = true} : vector<8x1xf32> -> vector<8x1xf32>
    %110 = vector.broadcast %109 : vector<8x1xf32> to vector<8x8xf32>
    %111 = arith.mulf %106, %110 : vector<8x8xf32>
    %cst_42 = arith.constant dense<0.000000e+00> : vector<8x8xf32>
    %112 = tpu.matmul %111, %98, %cst_42 {dimension_numbers = #tpu.dot_dimension_numbers<[1], [0], [0], [1], [0, 0, 1, 1], [], []>} : vector<8x8xf32>, vector<8x8xf32>, vector<8x8xf32> -> vector<8x8xf32>
    %113 = tpu.concatenate %61, %78, %95, %112 in 1 : vector<8x8xf32>, vector<8x8xf32>, vector<8x8xf32>, vector<8x8xf32> -> vector<8x32xf32>
    %c0_43 = arith.constant 0 : index
    %c0_44 = arith.constant 0 : index
    %c0_45 = arith.constant 0 : index
    %114 = vector.load %arg8[%c0_43, %c0_44, %c0_45] : memref<2x32x32xf32, #tpu.memory_space<vmem>>, vector<1x32x32xf32>
    %115 = vector.shape_cast %114 : vector<1x32x32xf32> to vector<32x32xf32>
    %cst_46 = arith.constant dense<0.000000e+00> : vector<8x32xf32>
    %116 = tpu.matmul %113, %115, %cst_46 {dimension_numbers = #tpu.dot_dimension_numbers<[1], [0], [0], [1], [0, 0, 1, 1], [], []>} : vector<8x32xf32>, vector<32x32xf32>, vector<8x32xf32> -> vector<8x32xf32>
    %c0_47 = arith.constant 0 : index
    %c0_48 = arith.constant 0 : index
    %c0_49 = arith.constant 0 : index
    %117 = vector.load %arg9[%c0_47, %c0_48, %c0_49] : memref<2x1x32xf32, #tpu.memory_space<vmem>>, vector<1x1x32xf32>
    %118 = vector.shape_cast %117 : vector<1x1x32xf32> to vector<1x32xf32>
    %119 = vector.broadcast %118 : vector<1x32xf32> to vector<8x32xf32>
    %120 = arith.addf %116, %119 : vector<8x32xf32>
    %121 = arith.addf %34, %120 : vector<8x32xf32>
    %c0_50 = arith.constant 0 : index
    %c0_51 = arith.constant 0 : index
    %c0_52 = arith.constant 0 : index
    %122 = vector.load %arg10[%c0_50, %c0_51, %c0_52] : memref<2x1x32xf32, #tpu.memory_space<vmem>>, vector<1x1x32xf32>
    %123 = vector.shape_cast %122 : vector<1x1x32xf32> to vector<1x32xf32>
    %c0_53 = arith.constant 0 : index
    %c0_54 = arith.constant 0 : index
    %c0_55 = arith.constant 0 : index
    %124 = vector.load %arg11[%c0_53, %c0_54, %c0_55] : memref<2x1x32xf32, #tpu.memory_space<vmem>>, vector<1x1x32xf32>
    %125 = vector.shape_cast %124 : vector<1x1x32xf32> to vector<1x32xf32>
    %cst_56 = arith.constant dense<0.000000e+00> : vector<8xf32>
    %126 = vector.multi_reduction <add>, %121, %cst_56 [1] : vector<8x32xf32> to vector<8xf32>
    %127 = vector.shape_cast %126 : vector<8xf32> to vector<8x1xf32>
    %cst_57 = arith.constant 3.200000e+01 : f32
    %128 = vector.broadcast %cst_57 : f32 to vector<8x1xf32>
    %129 = arith.divf %127, %128 : vector<8x1xf32>
    %130 = vector.broadcast %129 : vector<8x1xf32> to vector<8x32xf32>
    %131 = arith.subf %121, %130 : vector<8x32xf32>
    %132 = arith.mulf %131, %131 : vector<8x32xf32>
    %cst_58 = arith.constant dense<0.000000e+00> : vector<8xf32>
    %133 = vector.multi_reduction <add>, %132, %cst_58 [1] : vector<8x32xf32> to vector<8xf32>
    %134 = vector.shape_cast %133 : vector<8xf32> to vector<8x1xf32>
    %cst_59 = arith.constant 3.200000e+01 : f32
    %135 = vector.broadcast %cst_59 : f32 to vector<8x1xf32>
    %136 = arith.divf %134, %135 : vector<8x1xf32>
    %137 = vector.broadcast %129 : vector<8x1xf32> to vector<8x32xf32>
    %138 = arith.subf %121, %137 : vector<8x32xf32>
    %cst_60 = arith.constant 9.99999996E-13 : f32
    %139 = vector.broadcast %cst_60 : f32 to vector<8x1xf32>
    %140 = arith.addf %136, %139 : vector<8x1xf32>
    %141 = math.rsqrt %140 : vector<8x1xf32>
    %142 = vector.broadcast %141 : vector<8x1xf32> to vector<8x32xf32>
    %143 = arith.mulf %138, %142 : vector<8x32xf32>
    %144 = vector.broadcast %123 : vector<1x32xf32> to vector<8x32xf32>
    %145 = arith.mulf %143, %144 : vector<8x32xf32>
    %146 = vector.broadcast %125 : vector<1x32xf32> to vector<8x32xf32>
    %147 = arith.addf %145, %146 : vector<8x32xf32>
    %c0_61 = arith.constant 0 : index
    %c0_62 = arith.constant 0 : index
    %c0_63 = arith.constant 0 : index
    %148 = vector.load %arg12[%c0_61, %c0_62, %c0_63] : memref<2x32x128xf32, #tpu.memory_space<vmem>>, vector<1x32x128xf32>
    %149 = vector.shape_cast %148 : vector<1x32x128xf32> to vector<32x128xf32>
    %cst_64 = arith.constant dense<0.000000e+00> : vector<8x128xf32>
    %150 = tpu.matmul %147, %149, %cst_64 {dimension_numbers = #tpu.dot_dimension_numbers<[1], [0], [0], [1], [0, 0, 1, 1], [], []>} : vector<8x32xf32>, vector<32x128xf32>, vector<8x128xf32> -> vector<8x128xf32>
    %c0_65 = arith.constant 0 : index
    %c0_66 = arith.constant 0 : index
    %c0_67 = arith.constant 0 : index
    %151 = vector.load %arg13[%c0_65, %c0_66, %c0_67] : memref<2x1x128xf32, #tpu.memory_space<vmem>>, vector<1x1x128xf32>
    %152 = vector.shape_cast %151 : vector<1x1x128xf32> to vector<1x128xf32>
    %153 = vector.broadcast %152 : vector<1x128xf32> to vector<8x128xf32>
    %154 = arith.addf %150, %153 : vector<8x128xf32>
    %cst_68 = arith.constant 5.000000e-01 : f32
    %155 = vector.broadcast %cst_68 : f32 to vector<8x128xf32>
    %156 = arith.mulf %155, %154 : vector<8x128xf32>
    %cst_69 = arith.constant 0.707106769 : f32
    %157 = vector.broadcast %cst_69 : f32 to vector<8x128xf32>
    %158 = arith.mulf %154, %157 : vector<8x128xf32>
    %159 = math.absf %158 : vector<8x128xf32>
    %cst_70 = arith.constant 0.327591091 : f32
    %160 = vector.broadcast %cst_70 : f32 to vector<8x128xf32>
    %161 = arith.mulf %160, %159 : vector<8x128xf32>
    %cst_71 = arith.constant 1.000000e+00 : f32
    %162 = vector.broadcast %cst_71 : f32 to vector<8x128xf32>
    %163 = arith.addf %162, %161 : vector<8x128xf32>
    %cst_72 = arith.constant 1.000000e+00 : f32
    %164 = vector.broadcast %cst_72 : f32 to vector<8x128xf32>
    %165 = arith.divf %164, %163 : vector<8x128xf32>
    %cst_73 = arith.constant 1.06140542 : f32
    %166 = vector.broadcast %cst_73 : f32 to vector<8x128xf32>
    %167 = arith.mulf %166, %165 : vector<8x128xf32>
    %cst_74 = arith.constant -1.45315206 : f32
    %168 = vector.broadcast %cst_74 : f32 to vector<8x128xf32>
    %169 = arith.addf %167, %168 : vector<8x128xf32>
    %170 = arith.mulf %169, %165 : vector<8x128xf32>
    %cst_75 = arith.constant 1.42141378 : f32
    %171 = vector.broadcast %cst_75 : f32 to vector<8x128xf32>
    %172 = arith.addf %170, %171 : vector<8x128xf32>
    %173 = arith.mulf %172, %165 : vector<8x128xf32>
    %cst_76 = arith.constant -0.284496725 : f32
    %174 = vector.broadcast %cst_76 : f32 to vector<8x128xf32>
    %175 = arith.addf %173, %174 : vector<8x128xf32>
    %176 = arith.mulf %175, %165 : vector<8x128xf32>
    %cst_77 = arith.constant 0.254829586 : f32
    %177 = vector.broadcast %cst_77 : f32 to vector<8x128xf32>
    %178 = arith.addf %176, %177 : vector<8x128xf32>
    %179 = arith.mulf %178, %165 : vector<8x128xf32>
    %cst_78 = arith.constant 0.000000e+00 : f32
    %180 = vector.broadcast %cst_78 : f32 to vector<8x128xf32>
    %181 = arith.subf %180, %159 : vector<8x128xf32>
    %182 = arith.mulf %181, %159 : vector<8x128xf32>
    %183 = math.exp %182 : vector<8x128xf32>
    %184 = arith.mulf %179, %183 : vector<8x128xf32>
    %cst_79 = arith.constant 1.000000e+00 : f32
    %185 = vector.broadcast %cst_79 : f32 to vector<8x128xf32>
    %186 = arith.subf %185, %184 : vector<8x128xf32>
    %cst_80 = arith.constant 0.000000e+00 : f32
    %187 = vector.broadcast %cst_80 : f32 to vector<8x128xf32>
    %188 = arith.cmpf oge, %158, %187 : vector<8x128xf32>
    %cst_81 = arith.constant 0.000000e+00 : f32
    %189 = vector.broadcast %cst_81 : f32 to vector<8x128xf32>
    %190 = arith.subf %189, %186 : vector<8x128xf32>
    %191 = arith.select %188, %186, %190 : vector<8x128xi1>, vector<8x128xf32>
    %cst_82 = arith.constant 1.000000e+00 : f32
    %192 = vector.broadcast %cst_82 : f32 to vector<8x128xf32>
    %193 = arith.addf %192, %191 : vector<8x128xf32>
    %194 = arith.mulf %156, %193 : vector<8x128xf32>
    %c0_83 = arith.constant 0 : index
    %c0_84 = arith.constant 0 : index
    %c0_85 = arith.constant 0 : index
    %195 = vector.load %arg14[%c0_83, %c0_84, %c0_85] : memref<2x128x32xf32, #tpu.memory_space<vmem>>, vector<1x128x32xf32>
    %196 = vector.shape_cast %195 : vector<1x128x32xf32> to vector<128x32xf32>
    %cst_86 = arith.constant dense<0.000000e+00> : vector<8x32xf32>
    %197 = tpu.matmul %194, %196, %cst_86 {dimension_numbers = #tpu.dot_dimension_numbers<[1], [0], [0], [1], [0, 0, 1, 1], [], []>} : vector<8x128xf32>, vector<128x32xf32>, vector<8x32xf32> -> vector<8x32xf32>
    %c0_87 = arith.constant 0 : index
    %c0_88 = arith.constant 0 : index
    %c0_89 = arith.constant 0 : index
    %198 = vector.load %arg15[%c0_87, %c0_88, %c0_89] : memref<2x1x32xf32, #tpu.memory_space<vmem>>, vector<1x1x32xf32>
    %199 = vector.shape_cast %198 : vector<1x1x32xf32> to vector<1x32xf32>
    %200 = vector.broadcast %199 : vector<1x32xf32> to vector<8x32xf32>
    %201 = arith.addf %197, %200 : vector<8x32xf32>
    %202 = arith.addf %147, %201 : vector<8x32xf32>
    %c0_90 = arith.constant 0 : index
    %c0_91 = arith.constant 0 : index
    %c0_92 = arith.constant 0 : index
    %203 = vector.load %arg16[%c0_90, %c0_91, %c0_92] : memref<2x1x32xf32, #tpu.memory_space<vmem>>, vector<1x1x32xf32>
    %204 = vector.shape_cast %203 : vector<1x1x32xf32> to vector<1x32xf32>
    %c0_93 = arith.constant 0 : index
    %c0_94 = arith.constant 0 : index
    %c0_95 = arith.constant 0 : index
    %205 = vector.load %arg17[%c0_93, %c0_94, %c0_95] : memref<2x1x32xf32, #tpu.memory_space<vmem>>, vector<1x1x32xf32>
    %206 = vector.shape_cast %205 : vector<1x1x32xf32> to vector<1x32xf32>
    %cst_96 = arith.constant dense<0.000000e+00> : vector<8xf32>
    %207 = vector.multi_reduction <add>, %202, %cst_96 [1] : vector<8x32xf32> to vector<8xf32>
    %208 = vector.shape_cast %207 : vector<8xf32> to vector<8x1xf32>
    %cst_97 = arith.constant 3.200000e+01 : f32
    %209 = vector.broadcast %cst_97 : f32 to vector<8x1xf32>
    %210 = arith.divf %208, %209 : vector<8x1xf32>
    %211 = vector.broadcast %210 : vector<8x1xf32> to vector<8x32xf32>
    %212 = arith.subf %202, %211 : vector<8x32xf32>
    %213 = arith.mulf %212, %212 : vector<8x32xf32>
    %cst_98 = arith.constant dense<0.000000e+00> : vector<8xf32>
    %214 = vector.multi_reduction <add>, %213, %cst_98 [1] : vector<8x32xf32> to vector<8xf32>
    %215 = vector.shape_cast %214 : vector<8xf32> to vector<8x1xf32>
    %cst_99 = arith.constant 3.200000e+01 : f32
    %216 = vector.broadcast %cst_99 : f32 to vector<8x1xf32>
    %217 = arith.divf %215, %216 : vector<8x1xf32>
    %218 = vector.broadcast %210 : vector<8x1xf32> to vector<8x32xf32>
    %219 = arith.subf %202, %218 : vector<8x32xf32>
    %cst_100 = arith.constant 9.99999996E-13 : f32
    %220 = vector.broadcast %cst_100 : f32 to vector<8x1xf32>
    %221 = arith.addf %217, %220 : vector<8x1xf32>
    %222 = math.rsqrt %221 : vector<8x1xf32>
    %223 = vector.broadcast %222 : vector<8x1xf32> to vector<8x32xf32>
    %224 = arith.mulf %219, %223 : vector<8x32xf32>
    %225 = vector.broadcast %204 : vector<1x32xf32> to vector<8x32xf32>
    %226 = arith.mulf %224, %225 : vector<8x32xf32>
    %227 = vector.broadcast %206 : vector<1x32xf32> to vector<8x32xf32>
    %228 = arith.addf %226, %227 : vector<8x32xf32>
    %c1 = arith.constant 1 : index
    %c0_101 = arith.constant 0 : index
    %c0_102 = arith.constant 0 : index
    %229 = vector.load %arg6[%c1, %c0_101, %c0_102] : memref<2x32x96xf32, #tpu.memory_space<vmem>>, vector<1x32x96xf32>
    %230 = vector.shape_cast %229 : vector<1x32x96xf32> to vector<32x96xf32>
    %cst_103 = arith.constant dense<0.000000e+00> : vector<8x96xf32>
    %231 = tpu.matmul %228, %230, %cst_103 {dimension_numbers = #tpu.dot_dimension_numbers<[1], [0], [0], [1], [0, 0, 1, 1], [], []>} : vector<8x32xf32>, vector<32x96xf32>, vector<8x96xf32> -> vector<8x96xf32>
    %c1_104 = arith.constant 1 : index
    %c0_105 = arith.constant 0 : index
    %c0_106 = arith.constant 0 : index
    %232 = vector.load %arg7[%c1_104, %c0_105, %c0_106] : memref<2x1x96xf32, #tpu.memory_space<vmem>>, vector<1x1x96xf32>
    %233 = vector.shape_cast %232 : vector<1x1x96xf32> to vector<1x96xf32>
    %234 = vector.broadcast %233 : vector<1x96xf32> to vector<8x96xf32>
    %235 = arith.addf %231, %234 : vector<8x96xf32>
    %236 = vector.extract_strided_slice %235 {offsets = [0, 0], sizes = [8, 32], strides = [1, 1]} : vector<8x96xf32> to vector<8x32xf32>
    %237 = vector.extract_strided_slice %235 {offsets = [0, 32], sizes = [8, 32], strides = [1, 1]} : vector<8x96xf32> to vector<8x32xf32>
    %238 = vector.extract_strided_slice %235 {offsets = [0, 64], sizes = [8, 32], strides = [1, 1]} : vector<8x96xf32> to vector<8x32xf32>
    %239 = vector.extract_strided_slice %236 {offsets = [0, 0], sizes = [8, 8], strides = [1, 1]} : vector<8x32xf32> to vector<8x8xf32>
    %240 = vector.extract_strided_slice %237 {offsets = [0, 0], sizes = [8, 8], strides = [1, 1]} : vector<8x32xf32> to vector<8x8xf32>
    %241 = vector.extract_strided_slice %238 {offsets = [0, 0], sizes = [8, 8], strides = [1, 1]} : vector<8x32xf32> to vector<8x8xf32>
    %cst_107 = arith.constant dense<0.000000e+00> : vector<8x8xf32>
    %242 = tpu.matmul %239, %240, %cst_107 {dimension_numbers = #tpu.dot_dimension_numbers<[1], [1], [0], [0], [0, 0, 1, 0], [], []>} : vector<8x8xf32>, vector<8x8xf32>, vector<8x8xf32> -> vector<8x8xf32>
    %cst_108 = arith.constant 0.353553385 : f32
    %243 = vector.broadcast %cst_108 : f32 to vector<8x8xf32>
    %244 = arith.mulf %242, %243 : vector<8x8xf32>
    %cst_109 = arith.constant dense<0xFF800000> : vector<8xf32>
    %245 = vector.multi_reduction <maximumf>, %244, %cst_109 [1] : vector<8x8xf32> to vector<8xf32>
    %246 = vector.shape_cast %245 : vector<8xf32> to vector<8x1xf32>
    %247 = vector.broadcast %246 : vector<8x1xf32> to vector<8x8xf32>
    %248 = arith.subf %244, %247 : vector<8x8xf32>
    %249 = math.exp %248 : vector<8x8xf32>
    %cst_110 = arith.constant dense<0.000000e+00> : vector<8xf32>
    %250 = vector.multi_reduction <add>, %249, %cst_110 [1] : vector<8x8xf32> to vector<8xf32>
    %251 = vector.shape_cast %250 : vector<8xf32> to vector<8x1xf32>
    %252 = tpu.reciprocal %251 {approx = true} : vector<8x1xf32> -> vector<8x1xf32>
    %253 = vector.broadcast %252 : vector<8x1xf32> to vector<8x8xf32>
    %254 = arith.mulf %249, %253 : vector<8x8xf32>
    %cst_111 = arith.constant dense<0.000000e+00> : vector<8x8xf32>
    %255 = tpu.matmul %254, %241, %cst_111 {dimension_numbers = #tpu.dot_dimension_numbers<[1], [0], [0], [1], [0, 0, 1, 1], [], []>} : vector<8x8xf32>, vector<8x8xf32>, vector<8x8xf32> -> vector<8x8xf32>
    %256 = vector.extract_strided_slice %236 {offsets = [0, 8], sizes = [8, 8], strides = [1, 1]} : vector<8x32xf32> to vector<8x8xf32>
    %257 = vector.extract_strided_slice %237 {offsets = [0, 8], sizes = [8, 8], strides = [1, 1]} : vector<8x32xf32> to vector<8x8xf32>
    %258 = vector.extract_strided_slice %238 {offsets = [0, 8], sizes = [8, 8], strides = [1, 1]} : vector<8x32xf32> to vector<8x8xf32>
    %cst_112 = arith.constant dense<0.000000e+00> : vector<8x8xf32>
    %259 = tpu.matmul %256, %257, %cst_112 {dimension_numbers = #tpu.dot_dimension_numbers<[1], [1], [0], [0], [0, 0, 1, 0], [], []>} : vector<8x8xf32>, vector<8x8xf32>, vector<8x8xf32> -> vector<8x8xf32>
    %cst_113 = arith.constant 0.353553385 : f32
    %260 = vector.broadcast %cst_113 : f32 to vector<8x8xf32>
    %261 = arith.mulf %259, %260 : vector<8x8xf32>
    %cst_114 = arith.constant dense<0xFF800000> : vector<8xf32>
    %262 = vector.multi_reduction <maximumf>, %261, %cst_114 [1] : vector<8x8xf32> to vector<8xf32>
    %263 = vector.shape_cast %262 : vector<8xf32> to vector<8x1xf32>
    %264 = vector.broadcast %263 : vector<8x1xf32> to vector<8x8xf32>
    %265 = arith.subf %261, %264 : vector<8x8xf32>
    %266 = math.exp %265 : vector<8x8xf32>
    %cst_115 = arith.constant dense<0.000000e+00> : vector<8xf32>
    %267 = vector.multi_reduction <add>, %266, %cst_115 [1] : vector<8x8xf32> to vector<8xf32>
    %268 = vector.shape_cast %267 : vector<8xf32> to vector<8x1xf32>
    %269 = tpu.reciprocal %268 {approx = true} : vector<8x1xf32> -> vector<8x1xf32>
    %270 = vector.broadcast %269 : vector<8x1xf32> to vector<8x8xf32>
    %271 = arith.mulf %266, %270 : vector<8x8xf32>
    %cst_116 = arith.constant dense<0.000000e+00> : vector<8x8xf32>
    %272 = tpu.matmul %271, %258, %cst_116 {dimension_numbers = #tpu.dot_dimension_numbers<[1], [0], [0], [1], [0, 0, 1, 1], [], []>} : vector<8x8xf32>, vector<8x8xf32>, vector<8x8xf32> -> vector<8x8xf32>
    %273 = vector.extract_strided_slice %236 {offsets = [0, 16], sizes = [8, 8], strides = [1, 1]} : vector<8x32xf32> to vector<8x8xf32>
    %274 = vector.extract_strided_slice %237 {offsets = [0, 16], sizes = [8, 8], strides = [1, 1]} : vector<8x32xf32> to vector<8x8xf32>
    %275 = vector.extract_strided_slice %238 {offsets = [0, 16], sizes = [8, 8], strides = [1, 1]} : vector<8x32xf32> to vector<8x8xf32>
    %cst_117 = arith.constant dense<0.000000e+00> : vector<8x8xf32>
    %276 = tpu.matmul %273, %274, %cst_117 {dimension_numbers = #tpu.dot_dimension_numbers<[1], [1], [0], [0], [0, 0, 1, 0], [], []>} : vector<8x8xf32>, vector<8x8xf32>, vector<8x8xf32> -> vector<8x8xf32>
    %cst_118 = arith.constant 0.353553385 : f32
    %277 = vector.broadcast %cst_118 : f32 to vector<8x8xf32>
    %278 = arith.mulf %276, %277 : vector<8x8xf32>
    %cst_119 = arith.constant dense<0xFF800000> : vector<8xf32>
    %279 = vector.multi_reduction <maximumf>, %278, %cst_119 [1] : vector<8x8xf32> to vector<8xf32>
    %280 = vector.shape_cast %279 : vector<8xf32> to vector<8x1xf32>
    %281 = vector.broadcast %280 : vector<8x1xf32> to vector<8x8xf32>
    %282 = arith.subf %278, %281 : vector<8x8xf32>
    %283 = math.exp %282 : vector<8x8xf32>
    %cst_120 = arith.constant dense<0.000000e+00> : vector<8xf32>
    %284 = vector.multi_reduction <add>, %283, %cst_120 [1] : vector<8x8xf32> to vector<8xf32>
    %285 = vector.shape_cast %284 : vector<8xf32> to vector<8x1xf32>
    %286 = tpu.reciprocal %285 {approx = true} : vector<8x1xf32> -> vector<8x1xf32>
    %287 = vector.broadcast %286 : vector<8x1xf32> to vector<8x8xf32>
    %288 = arith.mulf %283, %287 : vector<8x8xf32>
    %cst_121 = arith.constant dense<0.000000e+00> : vector<8x8xf32>
    %289 = tpu.matmul %288, %275, %cst_121 {dimension_numbers = #tpu.dot_dimension_numbers<[1], [0], [0], [1], [0, 0, 1, 1], [], []>} : vector<8x8xf32>, vector<8x8xf32>, vector<8x8xf32> -> vector<8x8xf32>
    %290 = vector.extract_strided_slice %236 {offsets = [0, 24], sizes = [8, 8], strides = [1, 1]} : vector<8x32xf32> to vector<8x8xf32>
    %291 = vector.extract_strided_slice %237 {offsets = [0, 24], sizes = [8, 8], strides = [1, 1]} : vector<8x32xf32> to vector<8x8xf32>
    %292 = vector.extract_strided_slice %238 {offsets = [0, 24], sizes = [8, 8], strides = [1, 1]} : vector<8x32xf32> to vector<8x8xf32>
    %cst_122 = arith.constant dense<0.000000e+00> : vector<8x8xf32>
    %293 = tpu.matmul %290, %291, %cst_122 {dimension_numbers = #tpu.dot_dimension_numbers<[1], [1], [0], [0], [0, 0, 1, 0], [], []>} : vector<8x8xf32>, vector<8x8xf32>, vector<8x8xf32> -> vector<8x8xf32>
    %cst_123 = arith.constant 0.353553385 : f32
    %294 = vector.broadcast %cst_123 : f32 to vector<8x8xf32>
    %295 = arith.mulf %293, %294 : vector<8x8xf32>
    %cst_124 = arith.constant dense<0xFF800000> : vector<8xf32>
    %296 = vector.multi_reduction <maximumf>, %295, %cst_124 [1] : vector<8x8xf32> to vector<8xf32>
    %297 = vector.shape_cast %296 : vector<8xf32> to vector<8x1xf32>
    %298 = vector.broadcast %297 : vector<8x1xf32> to vector<8x8xf32>
    %299 = arith.subf %295, %298 : vector<8x8xf32>
    %300 = math.exp %299 : vector<8x8xf32>
    %cst_125 = arith.constant dense<0.000000e+00> : vector<8xf32>
    %301 = vector.multi_reduction <add>, %300, %cst_125 [1] : vector<8x8xf32> to vector<8xf32>
    %302 = vector.shape_cast %301 : vector<8xf32> to vector<8x1xf32>
    %303 = tpu.reciprocal %302 {approx = true} : vector<8x1xf32> -> vector<8x1xf32>
    %304 = vector.broadcast %303 : vector<8x1xf32> to vector<8x8xf32>
    %305 = arith.mulf %300, %304 : vector<8x8xf32>
    %cst_126 = arith.constant dense<0.000000e+00> : vector<8x8xf32>
    %306 = tpu.matmul %305, %292, %cst_126 {dimension_numbers = #tpu.dot_dimension_numbers<[1], [0], [0], [1], [0, 0, 1, 1], [], []>} : vector<8x8xf32>, vector<8x8xf32>, vector<8x8xf32> -> vector<8x8xf32>
    %307 = tpu.concatenate %255, %272, %289, %306 in 1 : vector<8x8xf32>, vector<8x8xf32>, vector<8x8xf32>, vector<8x8xf32> -> vector<8x32xf32>
    %c1_127 = arith.constant 1 : index
    %c0_128 = arith.constant 0 : index
    %c0_129 = arith.constant 0 : index
    %308 = vector.load %arg8[%c1_127, %c0_128, %c0_129] : memref<2x32x32xf32, #tpu.memory_space<vmem>>, vector<1x32x32xf32>
    %309 = vector.shape_cast %308 : vector<1x32x32xf32> to vector<32x32xf32>
    %cst_130 = arith.constant dense<0.000000e+00> : vector<8x32xf32>
    %310 = tpu.matmul %307, %309, %cst_130 {dimension_numbers = #tpu.dot_dimension_numbers<[1], [0], [0], [1], [0, 0, 1, 1], [], []>} : vector<8x32xf32>, vector<32x32xf32>, vector<8x32xf32> -> vector<8x32xf32>
    %c1_131 = arith.constant 1 : index
    %c0_132 = arith.constant 0 : index
    %c0_133 = arith.constant 0 : index
    %311 = vector.load %arg9[%c1_131, %c0_132, %c0_133] : memref<2x1x32xf32, #tpu.memory_space<vmem>>, vector<1x1x32xf32>
    %312 = vector.shape_cast %311 : vector<1x1x32xf32> to vector<1x32xf32>
    %313 = vector.broadcast %312 : vector<1x32xf32> to vector<8x32xf32>
    %314 = arith.addf %310, %313 : vector<8x32xf32>
    %315 = arith.addf %228, %314 : vector<8x32xf32>
    %c1_134 = arith.constant 1 : index
    %c0_135 = arith.constant 0 : index
    %c0_136 = arith.constant 0 : index
    %316 = vector.load %arg10[%c1_134, %c0_135, %c0_136] : memref<2x1x32xf32, #tpu.memory_space<vmem>>, vector<1x1x32xf32>
    %317 = vector.shape_cast %316 : vector<1x1x32xf32> to vector<1x32xf32>
    %c1_137 = arith.constant 1 : index
    %c0_138 = arith.constant 0 : index
    %c0_139 = arith.constant 0 : index
    %318 = vector.load %arg11[%c1_137, %c0_138, %c0_139] : memref<2x1x32xf32, #tpu.memory_space<vmem>>, vector<1x1x32xf32>
    %319 = vector.shape_cast %318 : vector<1x1x32xf32> to vector<1x32xf32>
    %cst_140 = arith.constant dense<0.000000e+00> : vector<8xf32>
    %320 = vector.multi_reduction <add>, %315, %cst_140 [1] : vector<8x32xf32> to vector<8xf32>
    %321 = vector.shape_cast %320 : vector<8xf32> to vector<8x1xf32>
    %cst_141 = arith.constant 3.200000e+01 : f32
    %322 = vector.broadcast %cst_141 : f32 to vector<8x1xf32>
    %323 = arith.divf %321, %322 : vector<8x1xf32>
    %324 = vector.broadcast %323 : vector<8x1xf32> to vector<8x32xf32>
    %325 = arith.subf %315, %324 : vector<8x32xf32>
    %326 = arith.mulf %325, %325 : vector<8x32xf32>
    %cst_142 = arith.constant dense<0.000000e+00> : vector<8xf32>
    %327 = vector.multi_reduction <add>, %326, %cst_142 [1] : vector<8x32xf32> to vector<8xf32>
    %328 = vector.shape_cast %327 : vector<8xf32> to vector<8x1xf32>
    %cst_143 = arith.constant 3.200000e+01 : f32
    %329 = vector.broadcast %cst_143 : f32 to vector<8x1xf32>
    %330 = arith.divf %328, %329 : vector<8x1xf32>
    %331 = vector.broadcast %323 : vector<8x1xf32> to vector<8x32xf32>
    %332 = arith.subf %315, %331 : vector<8x32xf32>
    %cst_144 = arith.constant 9.99999996E-13 : f32
    %333 = vector.broadcast %cst_144 : f32 to vector<8x1xf32>
    %334 = arith.addf %330, %333 : vector<8x1xf32>
    %335 = math.rsqrt %334 : vector<8x1xf32>
    %336 = vector.broadcast %335 : vector<8x1xf32> to vector<8x32xf32>
    %337 = arith.mulf %332, %336 : vector<8x32xf32>
    %338 = vector.broadcast %317 : vector<1x32xf32> to vector<8x32xf32>
    %339 = arith.mulf %337, %338 : vector<8x32xf32>
    %340 = vector.broadcast %319 : vector<1x32xf32> to vector<8x32xf32>
    %341 = arith.addf %339, %340 : vector<8x32xf32>
    %c1_145 = arith.constant 1 : index
    %c0_146 = arith.constant 0 : index
    %c0_147 = arith.constant 0 : index
    %342 = vector.load %arg12[%c1_145, %c0_146, %c0_147] : memref<2x32x128xf32, #tpu.memory_space<vmem>>, vector<1x32x128xf32>
    %343 = vector.shape_cast %342 : vector<1x32x128xf32> to vector<32x128xf32>
    %cst_148 = arith.constant dense<0.000000e+00> : vector<8x128xf32>
    %344 = tpu.matmul %341, %343, %cst_148 {dimension_numbers = #tpu.dot_dimension_numbers<[1], [0], [0], [1], [0, 0, 1, 1], [], []>} : vector<8x32xf32>, vector<32x128xf32>, vector<8x128xf32> -> vector<8x128xf32>
    %c1_149 = arith.constant 1 : index
    %c0_150 = arith.constant 0 : index
    %c0_151 = arith.constant 0 : index
    %345 = vector.load %arg13[%c1_149, %c0_150, %c0_151] : memref<2x1x128xf32, #tpu.memory_space<vmem>>, vector<1x1x128xf32>
    %346 = vector.shape_cast %345 : vector<1x1x128xf32> to vector<1x128xf32>
    %347 = vector.broadcast %346 : vector<1x128xf32> to vector<8x128xf32>
    %348 = arith.addf %344, %347 : vector<8x128xf32>
    %cst_152 = arith.constant 5.000000e-01 : f32
    %349 = vector.broadcast %cst_152 : f32 to vector<8x128xf32>
    %350 = arith.mulf %349, %348 : vector<8x128xf32>
    %cst_153 = arith.constant 0.707106769 : f32
    %351 = vector.broadcast %cst_153 : f32 to vector<8x128xf32>
    %352 = arith.mulf %348, %351 : vector<8x128xf32>
    %353 = math.absf %352 : vector<8x128xf32>
    %cst_154 = arith.constant 0.327591091 : f32
    %354 = vector.broadcast %cst_154 : f32 to vector<8x128xf32>
    %355 = arith.mulf %354, %353 : vector<8x128xf32>
    %cst_155 = arith.constant 1.000000e+00 : f32
    %356 = vector.broadcast %cst_155 : f32 to vector<8x128xf32>
    %357 = arith.addf %356, %355 : vector<8x128xf32>
    %cst_156 = arith.constant 1.000000e+00 : f32
    %358 = vector.broadcast %cst_156 : f32 to vector<8x128xf32>
    %359 = arith.divf %358, %357 : vector<8x128xf32>
    %cst_157 = arith.constant 1.06140542 : f32
    %360 = vector.broadcast %cst_157 : f32 to vector<8x128xf32>
    %361 = arith.mulf %360, %359 : vector<8x128xf32>
    %cst_158 = arith.constant -1.45315206 : f32
    %362 = vector.broadcast %cst_158 : f32 to vector<8x128xf32>
    %363 = arith.addf %361, %362 : vector<8x128xf32>
    %364 = arith.mulf %363, %359 : vector<8x128xf32>
    %cst_159 = arith.constant 1.42141378 : f32
    %365 = vector.broadcast %cst_159 : f32 to vector<8x128xf32>
    %366 = arith.addf %364, %365 : vector<8x128xf32>
    %367 = arith.mulf %366, %359 : vector<8x128xf32>
    %cst_160 = arith.constant -0.284496725 : f32
    %368 = vector.broadcast %cst_160 : f32 to vector<8x128xf32>
    %369 = arith.addf %367, %368 : vector<8x128xf32>
    %370 = arith.mulf %369, %359 : vector<8x128xf32>
    %cst_161 = arith.constant 0.254829586 : f32
    %371 = vector.broadcast %cst_161 : f32 to vector<8x128xf32>
    %372 = arith.addf %370, %371 : vector<8x128xf32>
    %373 = arith.mulf %372, %359 : vector<8x128xf32>
    %cst_162 = arith.constant 0.000000e+00 : f32
    %374 = vector.broadcast %cst_162 : f32 to vector<8x128xf32>
    %375 = arith.subf %374, %353 : vector<8x128xf32>
    %376 = arith.mulf %375, %353 : vector<8x128xf32>
    %377 = math.exp %376 : vector<8x128xf32>
    %378 = arith.mulf %373, %377 : vector<8x128xf32>
    %cst_163 = arith.constant 1.000000e+00 : f32
    %379 = vector.broadcast %cst_163 : f32 to vector<8x128xf32>
    %380 = arith.subf %379, %378 : vector<8x128xf32>
    %cst_164 = arith.constant 0.000000e+00 : f32
    %381 = vector.broadcast %cst_164 : f32 to vector<8x128xf32>
    %382 = arith.cmpf oge, %352, %381 : vector<8x128xf32>
    %cst_165 = arith.constant 0.000000e+00 : f32
    %383 = vector.broadcast %cst_165 : f32 to vector<8x128xf32>
    %384 = arith.subf %383, %380 : vector<8x128xf32>
    %385 = arith.select %382, %380, %384 : vector<8x128xi1>, vector<8x128xf32>
    %cst_166 = arith.constant 1.000000e+00 : f32
    %386 = vector.broadcast %cst_166 : f32 to vector<8x128xf32>
    %387 = arith.addf %386, %385 : vector<8x128xf32>
    %388 = arith.mulf %350, %387 : vector<8x128xf32>
    %c1_167 = arith.constant 1 : index
    %c0_168 = arith.constant 0 : index
    %c0_169 = arith.constant 0 : index
    %389 = vector.load %arg14[%c1_167, %c0_168, %c0_169] : memref<2x128x32xf32, #tpu.memory_space<vmem>>, vector<1x128x32xf32>
    %390 = vector.shape_cast %389 : vector<1x128x32xf32> to vector<128x32xf32>
    %cst_170 = arith.constant dense<0.000000e+00> : vector<8x32xf32>
    %391 = tpu.matmul %388, %390, %cst_170 {dimension_numbers = #tpu.dot_dimension_numbers<[1], [0], [0], [1], [0, 0, 1, 1], [], []>} : vector<8x128xf32>, vector<128x32xf32>, vector<8x32xf32> -> vector<8x32xf32>
    %c1_171 = arith.constant 1 : index
    %c0_172 = arith.constant 0 : index
    %c0_173 = arith.constant 0 : index
    %392 = vector.load %arg15[%c1_171, %c0_172, %c0_173] : memref<2x1x32xf32, #tpu.memory_space<vmem>>, vector<1x1x32xf32>
    %393 = vector.shape_cast %392 : vector<1x1x32xf32> to vector<1x32xf32>
    %394 = vector.broadcast %393 : vector<1x32xf32> to vector<8x32xf32>
    %395 = arith.addf %391, %394 : vector<8x32xf32>
    %396 = arith.addf %341, %395 : vector<8x32xf32>
    %c1_174 = arith.constant 1 : index
    %c0_175 = arith.constant 0 : index
    %c0_176 = arith.constant 0 : index
    %397 = vector.load %arg16[%c1_174, %c0_175, %c0_176] : memref<2x1x32xf32, #tpu.memory_space<vmem>>, vector<1x1x32xf32>
    %398 = vector.shape_cast %397 : vector<1x1x32xf32> to vector<1x32xf32>
    %c1_177 = arith.constant 1 : index
    %c0_178 = arith.constant 0 : index
    %c0_179 = arith.constant 0 : index
    %399 = vector.load %arg17[%c1_177, %c0_178, %c0_179] : memref<2x1x32xf32, #tpu.memory_space<vmem>>, vector<1x1x32xf32>
    %400 = vector.shape_cast %399 : vector<1x1x32xf32> to vector<1x32xf32>
    %cst_180 = arith.constant dense<0.000000e+00> : vector<8xf32>
    %401 = vector.multi_reduction <add>, %396, %cst_180 [1] : vector<8x32xf32> to vector<8xf32>
    %402 = vector.shape_cast %401 : vector<8xf32> to vector<8x1xf32>
    %cst_181 = arith.constant 3.200000e+01 : f32
    %403 = vector.broadcast %cst_181 : f32 to vector<8x1xf32>
    %404 = arith.divf %402, %403 : vector<8x1xf32>
    %405 = vector.broadcast %404 : vector<8x1xf32> to vector<8x32xf32>
    %406 = arith.subf %396, %405 : vector<8x32xf32>
    %407 = arith.mulf %406, %406 : vector<8x32xf32>
    %cst_182 = arith.constant dense<0.000000e+00> : vector<8xf32>
    %408 = vector.multi_reduction <add>, %407, %cst_182 [1] : vector<8x32xf32> to vector<8xf32>
    %409 = vector.shape_cast %408 : vector<8xf32> to vector<8x1xf32>
    %cst_183 = arith.constant 3.200000e+01 : f32
    %410 = vector.broadcast %cst_183 : f32 to vector<8x1xf32>
    %411 = arith.divf %409, %410 : vector<8x1xf32>
    %412 = vector.broadcast %404 : vector<8x1xf32> to vector<8x32xf32>
    %413 = arith.subf %396, %412 : vector<8x32xf32>
    %cst_184 = arith.constant 9.99999996E-13 : f32
    %414 = vector.broadcast %cst_184 : f32 to vector<8x1xf32>
    %415 = arith.addf %411, %414 : vector<8x1xf32>
    %416 = math.rsqrt %415 : vector<8x1xf32>
    %417 = vector.broadcast %416 : vector<8x1xf32> to vector<8x32xf32>
    %418 = arith.mulf %413, %417 : vector<8x32xf32>
    %419 = vector.broadcast %398 : vector<1x32xf32> to vector<8x32xf32>
    %420 = arith.mulf %418, %419 : vector<8x32xf32>
    %421 = vector.broadcast %400 : vector<1x32xf32> to vector<8x32xf32>
    %422 = arith.addf %420, %421 : vector<8x32xf32>
    %423 = vector.extract_strided_slice %422 {offsets = [0, 0], sizes = [1, 32], strides = [1, 1]} : vector<8x32xf32> to vector<1x32xf32>
    %c0_185 = arith.constant 0 : index
    %c0_186 = arith.constant 0 : index
    %c0_187 = arith.constant 0 : index
    %424 = vector.load %arg18[%c0_185, %c0_186, %c0_187] : memref<1x1x32xf32, #tpu.memory_space<vmem>>, vector<1x1x32xf32>
    %425 = vector.shape_cast %424 : vector<1x1x32xf32> to vector<1x32xf32>
    %426 = vector.shape_cast %423 : vector<1x32xf32> to vector<1x1x32xf32>
    tpu.vector_store %arg18[%c0_185, %c0_186, %c0_187], %426 {strides = array<i32>} : memref<1x1x32xf32, #tpu.memory_space<vmem>>, vector<1x1x32xf32>,
    return
  }
  func.func @transform_0(%arg0: i32) -> (i32, i32) {
    %c0_i32 = arith.constant 0 : i32
    %c0_i32_0 = arith.constant 0 : i32
    return %arg0, %c0_i32 : i32, i32
  }
  func.func @transform_1(%arg0: i32) -> (i32, i32) {
    %c0_i32 = arith.constant 0 : i32
    %c0_i32_0 = arith.constant 0 : i32
    %c0_i32_1 = arith.constant 0 : i32
    return %c0_i32, %c0_i32_0 : i32, i32
  }
  func.func @transform_2(%arg0: i32) -> (i32, i32) {
    %c0_i32 = arith.constant 0 : i32
    %c0_i32_0 = arith.constant 0 : i32
    %c0_i32_1 = arith.constant 0 : i32
    return %c0_i32, %c0_i32_0 : i32, i32
  }
  func.func @transform_3(%arg0: i32) -> (i32, i32) {
    %c0_i32 = arith.constant 0 : i32
    %c0_i32_0 = arith.constant 0 : i32
    %c0_i32_1 = arith.constant 0 : i32
    return %c0_i32, %c0_i32_0 : i32, i32
  }
  func.func @transform_4(%arg0: i32) -> (i32, i32) {
    %c0_i32 = arith.constant 0 : i32
    %c0_i32_0 = arith.constant 0 : i32
    %c0_i32_1 = arith.constant 0 : i32
    return %c0_i32, %c0_i32_0 : i32, i32
  }
  func.func @transform_5(%arg0: i32) -> (i32, i32, i32) {
    %c0_i32 = arith.constant 0 : i32
    %c0_i32_0 = arith.constant 0 : i32
    %c0_i32_1 = arith.constant 0 : i32
    %c0_i32_2 = arith.constant 0 : i32
    return %c0_i32, %c0_i32_0, %c0_i32_1 : i32, i32, i32
  }
  func.func @transform_6(%arg0: i32) -> (i32, i32, i32) {
    %c0_i32 = arith.constant 0 : i32
    %c0_i32_0 = arith.constant 0 : i32
    %c0_i32_1 = arith.constant 0 : i32
    %c0_i32_2 = arith.constant 0 : i32
    return %c0_i32, %c0_i32_0, %c0_i32_1 : i32, i32, i32
  }
  func.func @transform_7(%arg0: i32) -> (i32, i32, i32) {
    %c0_i32 = arith.constant 0 : i32
    %c0_i32_0 = arith.constant 0 : i32
    %c0_i32_1 = arith.constant 0 : i32
    %c0_i32_2 = arith.constant 0 : i32
    return %c0_i32, %c0_i32_0, %c0_i32_1 : i32, i32, i32
  }
  func.func @transform_8(%arg0: i32) -> (i32, i32, i32) {
    %c0_i32 = arith.constant 0 : i32
    %c0_i32_0 = arith.constant 0 : i32
    %c0_i32_1 = arith.constant 0 : i32
    %c0_i32_2 = arith.constant 0 : i32
    return %c0_i32, %c0_i32_0, %c0_i32_1 : i32, i32, i32
  }
  func.func @transform_9(%arg0: i32) -> (i32, i32, i32) {
    %c0_i32 = arith.constant 0 : i32
    %c0_i32_0 = arith.constant 0 : i32
    %c0_i32_1 = arith.constant 0 : i32
    %c0_i32_2 = arith.constant 0 : i32
    return %c0_i32, %c0_i32_0, %c0_i32_1 : i32, i32, i32
  }
  func.func @transform_10(%arg0: i32) -> (i32, i32, i32) {
    %c0_i32 = arith.constant 0 : i32
    %c0_i32_0 = arith.constant 0 : i32
    %c0_i32_1 = arith.constant 0 : i32
    %c0_i32_2 = arith.constant 0 : i32
    return %c0_i32, %c0_i32_0, %c0_i32_1 : i32, i32, i32
  }
  func.func @transform_11(%arg0: i32) -> (i32, i32, i32) {
    %c0_i32 = arith.constant 0 : i32
    %c0_i32_0 = arith.constant 0 : i32
    %c0_i32_1 = arith.constant 0 : i32
    %c0_i32_2 = arith.constant 0 : i32
    return %c0_i32, %c0_i32_0, %c0_i32_1 : i32, i32, i32
  }
  func.func @transform_12(%arg0: i32) -> (i32, i32, i32) {
    %c0_i32 = arith.constant 0 : i32
    %c0_i32_0 = arith.constant 0 : i32
    %c0_i32_1 = arith.constant 0 : i32
    %c0_i32_2 = arith.constant 0 : i32
    return %c0_i32, %c0_i32_0, %c0_i32_1 : i32, i32, i32
  }
  func.func @transform_13(%arg0: i32) -> (i32, i32, i32) {
    %c0_i32 = arith.constant 0 : i32
    %c0_i32_0 = arith.constant 0 : i32
    %c0_i32_1 = arith.constant 0 : i32
    %c0_i32_2 = arith.constant 0 : i32
    return %c0_i32, %c0_i32_0, %c0_i32_1 : i32, i32, i32
  }
  func.func @transform_14(%arg0: i32) -> (i32, i32, i32) {
    %c0_i32 = arith.constant 0 : i32
    %c0_i32_0 = arith.constant 0 : i32
    %c0_i32_1 = arith.constant 0 : i32
    %c0_i32_2 = arith.constant 0 : i32
    return %c0_i32, %c0_i32_0, %c0_i32_1 : i32, i32, i32
  }
  func.func @transform_15(%arg0: i32) -> (i32, i32, i32) {
    %c0_i32 = arith.constant 0 : i32
    %c0_i32_0 = arith.constant 0 : i32
    %c0_i32_1 = arith.constant 0 : i32
    %c0_i32_2 = arith.constant 0 : i32
    return %c0_i32, %c0_i32_0, %c0_i32_1 : i32, i32, i32
  }
  func.func @transform_16(%arg0: i32) -> (i32, i32, i32) {
    %c0_i32 = arith.constant 0 : i32
    %c0_i32_0 = arith.constant 0 : i32
    %c0_i32_1 = arith.constant 0 : i32
    %c0_i32_2 = arith.constant 0 : i32
    return %c0_i32, %c0_i32_0, %c0_i32_1 : i32, i32, i32
  }
  func.func @transform_17(%arg0: i32) -> (i32, i32, i32) {
    %c0_i32 = arith.constant 0 : i32
    %c0_i32_0 = arith.constant 0 : i32
    %c0_i32_1 = arith.constant 0 : i32
    return %arg0, %c0_i32, %c0_i32_0 : i32, i32, i32
  }
}

</mosaic_0001>

<bundles_post_ra>
// kernel: model_wrapper_forward.1
= control target key start
LH: loop header
LB: loop body
LE: loop exit
PB: predicated region body
PF: predicated region fallthrough
CT: control target
= control target key end

     0   :  { %s4284_s0 = inlined_call_operand.vmem [shape: s32[16,1], index: 0, kind: input, shape index: {}]   ;;  %s4285_s1 = inlined_call_operand.vmem [shape: f32[64,32], index: 1, kind: input, shape index: {}]   ;;  %s4286_s2 = inlined_call_operand.vmem [shape: f32[8,32], index: 2, kind: input, shape index: {}]   ;;  %s4287_s3 = inlined_call_operand.vmem [shape: f32[1,32], index: 3, kind: input, shape index: {}]   ;;  %s4288_s4 = inlined_call_operand.vmem [shape: f32[1,32], index: 4, kind: input, shape index: {}]   ;;  %s4289_s5 = inlined_call_operand.vmem [shape: f32[2,32,96], index: 5, kind: input, shape index: {}]   ;;  %s4290_s6 = inlined_call_operand.vmem [shape: f32[2,1,96], index: 6, kind: input, shape index: {}]   ;;  %s4291_s7 = inlined_call_operand.vmem [shape: f32[2,32,32], index: 7, kind: input, shape index: {}]   ;;  %s4292_s8 = inlined_call_operand.vmem [shape: f32[2,1,32], index: 8, kind: input, shape index: {}]   ;;  %s4293_s9 = inlined_call_operand.vmem [shape: f32[2,1,32], index: 9, kind: input, shape index: {}]   ;;  %s4294_s10 = inlined_call_operand.vmem [shape: f32[2,1,32], index: 10, kind: input, shape index: {}]   ;;  %s4295_s11 = inlined_call_operand.vmem [shape: f32[2,32,128], index: 11, kind: input, shape index: {}]   ;;  %s4296_s12 = inlined_call_operand.vmem [shape: f32[2,1,128], index: 12, kind: input, shape index: {}]   ;;  %s4297_s13 = inlined_call_operand.vmem [shape: f32[2,128,32], index: 13, kind: input, shape index: {}]   ;;  %s4298_s14 = inlined_call_operand.vmem [shape: f32[2,1,32], index: 14, kind: input, shape index: {}]   ;;  %s4299_s15 = inlined_call_operand.vmem [shape: f32[2,1,32], index: 15, kind: input, shape index: {}]   ;;  %s4300_s16 = inlined_call_operand.vmem [shape: f32[2,1,32], index: 16, kind: input, shape index: {}]   ;;  %s4301_s17 = inlined_call_operand.hbm [shape: f32[2,1,32], index: 17, kind: output, shape index: {}]  }
   0x1   :  { %4320 = sst [smem:[#allocation10_spill]] %s4284_s0 }
   0x2   :  { %4321 = sst [smem:[#allocation11_spill]] %s4285_s1 }
   0x3   :  { %4322 = sst [smem:[#allocation12_spill]] %s4286_s2 }
   0x4   :  { %4323 = sst [smem:[#allocation13_spill]] %s4287_s3 }
   0x5   :  { %22 = vsyncpa [#allocation3], 0 }
   0x6   :  { %24 = vsyncpa [#allocation3 + $0x1], 0  ;;  %s3680_s24 = smov 0   ;;  %s3682_s25 = smov 0  }
   0x7   :  { %s3684_s26 = smov 0   ;;  %s3686_s27 = smov 0  }
   0x8 LB: > { %4324 = sst [smem:[#allocation5_spill]] %s3558_s24  ;;  %s3701_s28 = sadd.s32 4294967295, %s3570_s27   ;;  %s3570_s27 = sphi %s3686_s27, %s4349_s27   ;;  %s3566_s26 = sphi %s3684_s26, %s4351_s26   ;;  %s3562_s25 = sphi %s3682_s25, %s4353_s25   ;;  %s3558_s24 = sphi %s3680_s24, %s4352_s24  }
   0x9   : > { %4325 = sst [smem:[#allocation6_spill]] %s3566_s26  ;;  %s2970_s29 = sadd.s32 4294967294, %s3570_s27  }
   0xa   : > { %s3705_s0 = sadd.s32 1, %s3570_s27   ;;  %s399_s30 = sadd.s32 1, %s3566_s26 }
   0xb   : > { %4326 = sst [smem:[#allocation7_spill]] %s3705_s0  ;;  %s396_s18 = ssub.s32 %s3570_s27, %s3705_s0 }
   0xc   : > { %p409_p0 = scmp.ne.s32.totalorder %s3566_s26, %s3562_s25  ;;  %p397_p1 = scmp.eq.s32.totalorder %s396_s18, 0 }
   0xd   : > { %p410_p2 = scmp.eq.s32.totalorder %s3701_s28, 1  ;;  %p415_p3 = scmp.ne.s32.totalorder %s3562_s25, %s3558_s24 }
   0xe   : > { %p416_p4 = scmp.eq.s32.totalorder %s2970_s29, 1  ;;  %p2973_p7 = scmp.ge.s32.totalorder %s3570_s27, 1 }
   0xf   : > { %s3716_s19 = scalar_select %p397_p1, %s3566_s26, %s399_s30  }
  0x10   : > { %p3718_p5 = por %p410_p2, %p409_p0  ;;  %p3722_p6 = por %p416_p4, %p415_p3 }
  0x11   : > { %4327 = sst [smem:[#allocation8_spill]] %s3716_s19  ;;  %p489_p8 = scmp.lt.s32.totalorder %s3570_s27, 3 }
  0x12   : > { %s4329_s20 = scalar_select %p3722_p6, 1, 0 }
  0x13   : > { %p490_p9 = pnand %p2973_p7, %p489_p8 }
  0x14   : > { %4330 = sst [smem:[#allocation9_spill]] %s4329_s20  ;;  %p539_p10 = scmp.lt.s32.totalorder (!%p490_p9), %s3701_s28, 1 }
  0x15   : > { %493 = sbr.rel (%p490_p9) target bundleno = 6486 (0x1956), region = 88  ;;  %s4331_s23 = sld [smem:[#allocation11_spill]] (!%p490_p9) }
  0x16   : > { %s4332_s29 = sld [smem:[#allocation10_spill]] (!%p490_p9)  ;;  %s4308_s24 = smov (!%p490_p9), 72  }
  0x17   : > { %s4333_s2 = sld [smem:[#allocation12_spill]] (!%p490_p9)  ;;  %s3576_s20 = smov (!%p490_p9), 96  }
  0x18   : > { %s4334_s3 = sld [smem:[#allocation13_spill]] (!%p490_p9)  ;;  %s4319_s22 = smov (!%p490_p9), 120  }
  0x19   : > { %s4312_s26 = smov (!%p490_p9), 104   ;;  %s4315_s19 = smov (!%p490_p9), 64  }
  0x1a   : > { %v3572_v1 = vmov 0   ;;  %v3573_v2 = vmov 0.0   ;;  %s540_s18 = scalar_select %p539_p10, %s3701_s28, 1  ;;  %vm3574_vm0 = vmmov 0   ;;  %v544_v11 = vlaneseq  ;;  %v668_v25 = vld [vmem:[%s4289_s5 + $0x18] sm:$0xff]  ;;  %v667_v26 = vld [vmem:[%s4289_s5 + $0x10] sm:$0xff] }
  0x1b   : > { %v558_v0 = vld [vmem:[%s4331_s23 + $0x38] sm:$0xff]  ;;  %3459 = vset.pattern.permute.xlu0 %v3572_v1  ;;  %3168 = vmatprep.subr.mxu1 %v3573_v2  ;;  %v557_v3 = vld [vmem:[%s4331_s23 + $0x30] sm:$0xff]  ;;  %v556_v4 = vld [vmem:[%s4331_s23 + $0x28] sm:$0xff]  ;;  %vm560_vm1 = vcmask 523264   ;;  %vm636_vm3 = vcmask 261120   ;;  %vm752_vm4 = vcmask 64512  }
  0x1c   : > { %3169 = vmatpush3.msra.mxu1 %v558_v0  ;;  %3208 = vmatprep.subr.mxu0 %v3573_v2  ;;  %s2974_s21 = sshll.u32 %s540_s18, 3  ;;  %v555_v5 = vld [vmem:[%s4331_s23 + $0x20] sm:$0xff]  ;;  %v554_v7 = vld [vmem:[%s4331_s23 + $0x18] sm:$0xff]  ;;  %v553_v8 = vld [vmem:[%s4331_s23 + $0x10] sm:$0xff]  ;;  %v545_v12 = vand.u32 127, %v544_v11  ;;  %s4310_s0 = smov 48  }
  0x1d   : > { %3170 = vmatprep.subr.mxu1 %v3573_v2  ;;  %3184 = vmatprep.mubr.msk.f32.mxu1 %vm3574_vm0, %v3573_v2  ;;  %s542_s30 = scalar_lea.vmem %s4332_s29, %s2974_s21  ;;  %v552_v9 = vld [vmem:[%s4331_s23 + $0x8] sm:$0xff]  ;;  %v551_v10 = vld [vmem:[%s4331_s23] sm:$0xff]  ;;  %s3577_s21 = smov 88   ;;  %vm1426_vm5 = vcmask 130048   ;;  %vm1428_vm6 = vcmask 195584   ;;  %vm2900_vm9 = vcmask 253952  }
  0x1e   : > { %3171 = vmatpush3.msra.mxu1 %v557_v3  ;;  %3210 = vmatprep.mubr.msk.f32.mxu0 %vm3574_vm0, %v3573_v2  ;;  %v543_v6 = vld [vmem:[%s542_s30] sm:$0xff]  ;;  %v666_v27 = vld [vmem:[%s4289_s5 + $0x8] sm:$0xff]  ;;  %s4314_s29 = smov 80   ;;  %s4313_s30 = smov 112  }
  0x1f   : > { %3172 = vmatprep.subr.mxu1 %v3573_v2  ;;  %547 = vperm.xlu0 %3459, %v543_v6   ;;  %v559_v15 = vld [vmem:[%s4333_s2] sm:$0xff]  ;;  %s4309_s18 = smov 40  }
  0x20   : > { %3173 = vmatpush3.msra.mxu1 %v556_v4  ;;  %v665_v28 = vld [vmem:[%s4289_s5] sm:$0xff] }
  0x21   : > { %3174 = vmatprep.subr.mxu1 %v3573_v2  ;;  %v2976_v33 = vld [vmem:[%s4334_s3] ss:$0 sm:$0xff] }
  0x22   : > { %3175 = vmatpush3.msra.mxu1 %v555_v5  ;;  %v2977_v35 = vld [vmem:[%s4288_s4] ss:$0 sm:$0xff] }
  0x23   : > { %3176 = vmatprep.subr.mxu1 %v3573_v2  ;;  %v2978_v38 = vld [vmem:[%s4290_s6] ss:$0 sm:$0xff] }
  0x24   : > { %3177 = vmatpush3.msra.mxu1 %v554_v7 }
  0x25   : > { %3178 = vmatprep.subr.mxu1 %v3573_v2 }
  0x26   : > { %3179 = vmatpush3.msra.mxu1 %v553_v8 }
  0x27   : > { %3180 = vmatprep.subr.mxu1 %v3573_v2 }
  0x28   : > { %3181 = vmatpush3.msra.mxu1 %v552_v9 }
  0x29   : > { %3182 = vmatprep.subr.mxu1 %v3573_v2 }
  0x2a   : > { %3183 = vmatpush3.msra.mxu1 %v551_v10 }
  0x2b   : > { %3187 = vmatprep.subr.mxu1 %v3573_v2 }
  0x9a   : > { %v548_v13 = vpop.permute.xlu0 %547 }
  0x9b   : > { %vm549_vm2 = vcmp.eq.s32.totalorder %v548_v13, %v545_v12 }
  0x9c   : > { %v550_v14 = vsel %vm549_vm2, 1.0, %v3573_v2 }
  0x9d   : > { %3185 = vmatmul.mubr.msk.f32.vlgmr.msra.gmra.mxu1 %vm560_vm1, %v550_v14 }
  0x9e   : > { %3195 = vmatprep.mubr.msk.f32.mxu1 %vm3574_vm0, %v3573_v2  ;;  %3188 = vmatpush3.msra.mxu1 %v668_v25 }
  0x9f   : > { %3189 = vmatprep.subr.mxu1 %v3573_v2 }
  0xa0   : > { %3190 = vmatpush3.msra.mxu1 %v667_v26 }
  0xa1   : > { %3191 = vmatprep.subr.mxu1 %v3573_v2 }
  0xa2   : > { %3192 = vmatpush3.msra.mxu1 %v666_v27 }
  0xa3   : > { %3193 = vmatprep.subr.mxu1 %v3573_v2 }
  0xa4   : > { %3194 = vmatpush3.msra.mxu1 %v665_v28 }
  0xa5   : > { %3198 = vmatprep.subr.mxu1 %v3573_v2 }
 0x15d   : > { %v630_v16 = vpop.f32.mrf.mxu1 }
 0x15e   : > { %v631_v17 = vadd.f32 %v630_v16, %v559_v15 }
 0x15f   : > { %v3186_v18 = vpop.f32.mrf.mxu1 }
 0x160   : > { %v637_v19 = vsel %vm636_vm3, %v631_v17, 0.0 }
 0x161   : > { %638 = vadd.xlane.f32.xlu0 %v637_v19 }
 0x1ea   : > { %v639_v20 = vpop.xlane.xlu0 %638 }
 0x1eb   : > { %v641_v21 = vmul.f32 0.03125, %v639_v20 }
 0x1ed   : > { %v642_v22 = vsub.f32 %v631_v17, %v641_v21 }
 0x1ef   : > { %v643_v23 = vmul.f32 %v642_v22, %v642_v22 }
 0x1f1   : > { %v644_v24 = vsel %vm636_vm3, %v643_v23, 0.0 }
 0x1f2   : > { %645 = vadd.xlane.f32.xlu1 %v644_v24 }
 0x27b   : > { %v646_v29 = vpop.xlane.xlu1 %645 }
 0x27c   : > { %v647_v30 = vmul.f32 0.03125, %v646_v29 }
 0x27e   : > { %v648_v31 = vadd.f32 1e-12, %v647_v30 }
 0x280   : > { %3460 = vrsqrt.f32 %v648_v31 }
 0x28d   : > { %v3461_v32 = vpop.eup %3460 }
 0x28e   : > { %v650_v34 = vmul.f32 %v3461_v32, %v642_v22 }
 0x290   : > { %v657_v36 = vmul.f32 %v2976_v33, %v650_v34 }
 0x292   : > { %v3801_v37 = vadd.f32 %v2977_v35, %v657_v36 }
 0x294   : > { %3196 = vmatmul.mubr.msk.f32.vlgmr.msra.gmra.mxu1 %vm636_vm3, %v3801_v37 }
 0x295   : > { %3200 = vmatprep.mubr.msk.f32.mxu1 %vm3574_vm0, %v3573_v2 }
 0x354   : > { %v745_v39 = vpop.f32.mrf.mxu1 }
 0x355   : > { %v3810_v40 = vadd.f32 %v2978_v38, %v745_v39  ;;  %v1433_v39 = vld [vmem:[%s4291_s7 + $0x18] sm:$0xff] }
 0x356   : > { %v3197_v41 = vpop.f32.mrf.mxu1 }
 0x357   : > { %1249 = vrot.lane.b32.xlu0 %v3810_v40, %s4308_s24  ;;  %750 = vrot.lane.b32.xlu1 %v3810_v40, %s3576_s20  ;;  %s4311_s24 = smov 56   ;;  %v1432_v41 = vld [vmem:[%s4291_s7 + $0x10] sm:$0xff] }
 0x35b   : > { %917 = vrot.lane.b32.xlu1 %v3810_v40, %s3577_s21 }
 0x35f   : > { %915 = vrot.lane.b32.xlu1 %v3810_v40, %s4319_s22  ;;  %s4343_s22 = smov 8  }
 0x363   : > { %1083 = vrot.lane.b32.xlu1 %v3810_v40, %s4314_s29  ;;  %s4316_s29 = smov 24  }
 0x367   : > { %1081 = vrot.lane.b32.xlu1 %v3810_v40, %s4313_s30  ;;  %s4335_s30 = smov 120  }
 0x36b   : > { %1247 = vrot.lane.b32.xlu1 %v3810_v40, %s4312_s26  ;;  %s4338_s26 = smov 112  }
 0x3c9   : > { %v751_v42 = vpop.permute.xlu1 %750  ;;  %v1250_v47 = vpop.permute.xlu0 %1249 }
 0x3ca   : > { %3199 = vmatpush3.xpose.msk.msra.mxu1 %vm752_vm4, %v751_v42  ;;  %v1431_v42 = vld [vmem:[%s4291_s7 + $0x8] sm:$0xff] }
 0x3cb   : > { %3203 = vmatprep.subr.mxu1 %v3573_v2 }
 0x3cd   : > { %3201 = vmatmul.mubr.msk.f32.vlgmr.msra.gmra.mxu1 %vm752_vm4, %v3810_v40  ;;  %v918_v43 = vpop.permute.xlu1 %917 }
 0x3ce   : > { %3209 = vmatpush3.xpose.msk.msra.mxu0 %vm752_vm4, %v918_v43  ;;  %3205 = vmatprep.mubr.msk.f32.mxu1 %vm3574_vm0, %v3573_v2 }
 0x3cf   : > { %3218 = vmatprep.subr.mxu0 %v3573_v2 }
 0x3d1   : > { %v916_v44 = vpop.permute.xlu1 %915 }
 0x3d2   : > { %3211 = vmatmul.mubr.msk.f32.vlgmr.msra.gmra.mxu0 %vm752_vm4, %v916_v44  ;;  %v1430_v44 = vld [vmem:[%s4291_s7] sm:$0xff] }
 0x3d3   : > { %3220 = vmatprep.mubr.msk.f32.mxu0 %vm3574_vm0, %v3573_v2 }
 0x3d5   : > { %v1084_v45 = vpop.permute.xlu1 %1083 }
 0x3d6   : > { %3219 = vmatpush3.xpose.msk.msra.mxu0 %vm752_vm4, %v1084_v45 }
 0x3d7   : > { %3228 = vmatprep.subr.mxu0 %v3573_v2 }
 0x3d9   : > { %v1082_v46 = vpop.permute.xlu1 %1081 }
 0x3da   : > { %3221 = vmatmul.mubr.msk.f32.vlgmr.msra.gmra.mxu0 %vm752_vm4, %v1082_v46 }
 0x3db   : > { %3229 = vmatpush3.xpose.msk.msra.mxu0 %vm752_vm4, %v1250_v47  ;;  %3230 = vmatprep.mubr.msk.f32.mxu0 %vm3574_vm0, %v3573_v2 }
 0x3dc   : > { %3238 = vmatprep.subr.mxu0 %v3573_v2 }
 0x3dd   : > { %v1248_v48 = vpop.permute.xlu1 %1247 }
 0x3de   : > { %3231 = vmatmul.mubr.msk.f32.vlgmr.msra.gmra.mxu0 %vm752_vm4, %v1248_v48 }
 0x3df   : > { %3246 = vmatprep.mubr.msk.f32.mxu0 %vm3574_vm0, %v3573_v2  ;;  %3239 = vmatpush3.msra.mxu0 %v1433_v39 }
 0x3e0   : > { %3240 = vmatprep.subr.mxu0 %v3573_v2 }
 0x3e1   : > { %3241 = vmatpush3.msra.mxu0 %v1432_v41 }
 0x3e2   : > { %3242 = vmatprep.subr.mxu0 %v3573_v2 }
 0x3e3   : > { %3243 = vmatpush3.msra.mxu0 %v1431_v42 }
 0x3e4   : > { %3244 = vmatprep.subr.mxu0 %v3573_v2 }
 0x3e5   : > { %3245 = vmatpush3.msra.mxu0 %v1430_v44 }
 0x3e6   : > { %3260 = vmatprep.subr.mxu0 %v3573_v2 }
 0x48d   : > { %v823_v49 = vpop.f32.mrf.mxu1 }
 0x48e   : > { %v827_v50 = vmul.f32 0.35355338, %v823_v49 }
 0x48f   : > { %v3202_v51 = vpop.f32.mrf.mxu1 }
 0x490   : > { %v828_v52 = vsel %vm752_vm4, %v827_v50, -inf }
 0x491   : > { %829 = vmax.xlane.f32.xlu1 %v828_v52 }
 0x492   : > { %v989_v53 = vpop.f32.mrf.mxu0 }
 0x493   : > { %v993_v54 = vmul.f32 0.35355338, %v989_v53 }
 0x494   : > { %v3212_v55 = vpop.f32.mrf.mxu0 }
 0x495   : > { %v994_v56 = vsel %vm752_vm4, %v993_v54, -inf }
 0x496   : > { %995 = vmax.xlane.f32.xlu0 %v994_v56 }
 0x49a   : > { %v1155_v57 = vpop.f32.mrf.mxu0 }
 0x49b   : > { %v1159_v58 = vmul.f32 0.35355338, %v1155_v57  ;;  %v2992_v57 = vld [vmem:[%s4292_s8] ss:$0 sm:$0xff] }
 0x49c   : > { %v3222_v59 = vpop.f32.mrf.mxu0 }
 0x49d   : > { %v1160_v60 = vsel %vm752_vm4, %v1159_v58, -inf }
 0x49e   : > { %v1321_v61 = vpop.f32.mrf.mxu0  ;;  %1161 = vmax.xlane.f32.xlu1 %v1160_v60 }
 0x49f   : > { %v1325_v62 = vmul.f32 0.35355338, %v1321_v61 }
 0x4a0   : > { %v3232_v63 = vpop.f32.mrf.mxu0 }
 0x4a1   : > { %v1326_v0 = vsel %vm752_vm4, %v1325_v62, -inf }
 0x4a2   : > { %1327 = vmax.xlane.f32.xlu1 %v1326_v0 }
 0x4b3   : > { %839 = vrot.lane.b32.xlu1 %v3810_v40, %s4315_s19  ;;  %s4318_s19 = smov 8  }
 0x51a   : > { %v830_v1 = vpop.xlane.xlu1 %829 }
 0x51b   : > { %v831_v3 = vsub.f32 %v827_v50, %v830_v1 }
 0x51d   : > { %v832_v4 = vmul.f32 1.442695, %v831_v3 }
 0x51f   : > { %3462 = vpow2.f32 %v832_v4  ;;  %v996_v5 = vpop.xlane.xlu0 %995 }
 0x520   : > { %v997_v6 = vsub.f32 %v993_v54, %v996_v5  ;;  %v1547_v5 = vld [vmem:[%s4295_s11 + $0x18] sm:$0xff] }
 0x522   : > { %v998_v7 = vmul.f32 1.442695, %v997_v6  ;;  %v1546_v6 = vld [vmem:[%s4295_s11 + $0x10] sm:$0xff] }
 0x524   : > { %3464 = vpow2.f32 %v998_v7  ;;  %v1544_v7 = vld [vmem:[%s4295_s11] sm:$0xff] }
 0x527   : > { %v1162_v8 = vpop.xlane.xlu1 %1161 }
 0x528   : > { %v1163_v9 = vsub.f32 %v1159_v58, %v1162_v8 }
 0x52a   : > { %v1164_v10 = vmul.f32 1.442695, %v1163_v9 }
 0x52b   : > { %v1328_v11 = vpop.xlane.xlu1 %1327 }
 0x52c   : > { %v3463_v12 = vpop.eup %3462  ;;  %3466 = vpow2.f32 %v1164_v10  ;;  %v1329_v13 = vsub.f32 %v1325_v62, %v1328_v11 }
 0x52d   : > { %v834_v14 = vsel %vm752_vm4, %v3463_v12, 0.0 }
 0x52e   : > { %v1330_v15 = vmul.f32 1.442695, %v1329_v13  ;;  %835 = vadd.xlane.f32.xlu1 %v834_v14  ;;  %v2995_v14 = vld [vmem:[%s4294_s10] ss:$0 sm:$0xff] }
 0x52f   : > { %v840_v16 = vpop.permute.xlu1 %839 }
 0x530   : > { %3468 = vpow2.f32 %v1330_v15  ;;  %3204 = vmatpush3.msra.mxu1 %v840_v16 }
 0x531   : > { %v3465_v17 = vpop.eup %3464  ;;  %3213 = vmatprep.subr.mxu1 %v3573_v2 }
 0x532   : > { %v1000_v18 = vsel %vm752_vm4, %v3465_v17, 0.0 }
 0x533   : > { %1001 = vadd.xlane.f32.xlu0 %v1000_v18  ;;  %v1669_v18 = vld [vmem:[%s4297_s13 + $0x70] sm:$0xff] }
 0x539   : > { %v3467_v19 = vpop.eup %3466 }
 0x53a   : > { %v1166_v20 = vsel %vm752_vm4, %v3467_v19, 0.0 }
 0x53b   : > { %1167 = vadd.xlane.f32.xlu1 %v1166_v20  ;;  %v1667_v20 = vld [vmem:[%s4297_s13 + $0x60] sm:$0xff] }
 0x53d   : > { %v3469_v21 = vpop.eup %3468 }
 0x53e   : > { %v1332_v22 = vsel %vm752_vm4, %v3469_v21, 0.0 }
 0x53f   : > { %1333 = vadd.xlane.f32.xlu0 %v1332_v22  ;;  %v1665_v22 = vld [vmem:[%s4297_s13 + $0x50] sm:$0xff] }
 0x54c   : > { %1171 = vrot.lane.b32.xlu1 %v3810_v40, %s4310_s0  ;;  %s4341_s0 = smov 72  }
 0x550   : > { %1337 = vrot.lane.b32.xlu1 %v3810_v40, %s4309_s18  ;;  %s4342_s18 = smov 48  }
 0x555   : > { %1005 = vrot.lane.b32.xlu0 %v3810_v40, %s4311_s24  ;;  %s4317_s24 = smov 16  }
 0x5b7   : > { %v836_v23 = vpop.xlane.xlu1 %835 }
 0x5b8   : > { %3470 = vrcp.f32 %v836_v23  ;;  %v1664_v23 = vld [vmem:[%s4297_s13 + $0x48] sm:$0xff] }
 0x5bc   : > { %v1002_v24 = vpop.xlane.xlu0 %1001 }
 0x5bd   : > { %3472 = vrcp.f32 %v1002_v24  ;;  %v1663_v24 = vld [vmem:[%s4297_s13 + $0x40] sm:$0xff] }
 0x5c4   : > { %v1168_v25 = vpop.xlane.xlu1 %1167 }
 0x5c5   : > { %v3471_v26 = vpop.eup %3470  ;;  %3474 = vrcp.f32 %v1168_v25  ;;  %v1662_v25 = vld [vmem:[%s4297_s13 + $0x38] sm:$0xff] }
 0x5c6   : > { %v838_v27 = vmul.f32 %v3471_v26, %v3463_v12  ;;  %v2994_v12 = vld [vmem:[%s4293_s9] ss:$0 sm:$0xff]  ;;  %v1661_v26 = vld [vmem:[%s4297_s13 + $0x30] sm:$0xff] }
 0x5c8   : > { %v1334_v28 = vpop.xlane.xlu0 %1333  ;;  %3206 = vmatmul.mubr.msk.f32.vlgmr.msra.gmra.mxu1 %vm752_vm4, %v838_v27  ;;  %v1172_v32 = vpop.permute.xlu1 %1171  ;;  %v1660_v27 = vld [vmem:[%s4297_s13 + $0x28] sm:$0xff] }
 0x5c9   : > { %3476 = vrcp.f32 %v1334_v28  ;;  %3215 = vmatprep.mubr.msk.f32.mxu1 %vm3574_vm0, %v3573_v2  ;;  %v1659_v28 = vld [vmem:[%s4297_s13 + $0x20] sm:$0xff] }
 0x5ca   : > { %v3473_v29 = vpop.eup %3472 }
 0x5cb   : > { %v1004_v30 = vmul.f32 %v3473_v29, %v3465_v17  ;;  %v1670_v17 = vld [vmem:[%s4297_s13 + $0x78] sm:$0xff] }
 0x5cc   : > { %v1006_v31 = vpop.permute.xlu0 %1005  ;;  %v1338_v35 = vpop.permute.xlu1 %1337  ;;  %v1658_v29 = vld [vmem:[%s4297_s13 + $0x18] sm:$0xff] }
 0x5cd   : > { %3214 = vmatpush3.msra.mxu1 %v1006_v31  ;;  %v1656_v31 = vld [vmem:[%s4297_s13 + $0x8] sm:$0xff] }
 0x5ce   : > { %3216 = vmatmul.mubr.msk.f32.vlgmr.msra.gmra.mxu1 %vm752_vm4, %v1004_v30  ;;  %3223 = vmatprep.subr.mxu1 %v3573_v2  ;;  %v1657_v30 = vld [vmem:[%s4297_s13 + $0x10] sm:$0xff] }
 0x5cf   : > { %3224 = vmatpush3.msra.mxu1 %v1172_v32  ;;  %3225 = vmatprep.mubr.msk.f32.mxu1 %vm3574_vm0, %v3573_v2  ;;  %v1655_v32 = vld [vmem:[%s4297_s13] sm:$0xff] }
 0x5d0   : > { %3233 = vmatprep.subr.mxu1 %v3573_v2 }
 0x5d2   : > { %v3475_v33 = vpop.eup %3474 }
 0x5d3   : > { %v1170_v34 = vmul.f32 %v3475_v33, %v3467_v19  ;;  %v1668_v19 = vld [vmem:[%s4297_s13 + $0x68] sm:$0xff]  ;;  %v2996_v33 = vld [vmem:[%s4296_s12] ss:$0 sm:$0xff] }
 0x5d5   : > { %3226 = vmatmul.mubr.msk.f32.vlgmr.msra.gmra.mxu1 %vm752_vm4, %v1170_v34 }
 0x5d6   : > { %v3477_v36 = vpop.eup %3476  ;;  %3234 = vmatpush3.msra.mxu1 %v1338_v35  ;;  %3235 = vmatprep.mubr.msk.f32.mxu1 %vm3574_vm0, %v3573_v2 }
 0x5d7   : > { %v1336_v38 = vmul.f32 %v3477_v36, %v3469_v21  ;;  %3249 = vmatprep.subr.mxu1 %v3573_v2  ;;  %v1666_v21 = vld [vmem:[%s4297_s13 + $0x58] sm:$0xff] }
 0x5d9   : > { %3236 = vmatmul.mubr.msk.f32.vlgmr.msra.gmra.mxu1 %vm752_vm4, %v1336_v38 }
 0x5da   : > { %3257 = vmatprep.mubr.msk.f32.mxu1 %vm3574_vm0, %v3573_v2  ;;  %3250 = vmatpush3.msra.mxu1 %v1547_v5 }
 0x5db   : > { %3251 = vmatprep.subr.mxu1 %v3573_v2 }
 0x5dc   : > { %3252 = vmatpush3.msra.mxu1 %v1546_v6 }
 0x5dd   : > { %3253 = vmatprep.subr.mxu1 %v3573_v2 }
 0x688   : > { %v911_v40 = vpop.f32.mrf.mxu1 }
 0x68a   : > { %v3207_v43 = vpop.f32.mrf.mxu1 }
 0x68e   : > { %v1077_v45 = vpop.f32.mrf.mxu1 }
 0x68f   : > { %1414 = vrot.lane.b32.xlu0 %v1077_v45, %s4318_s19  ;;  %s4344_s19 = smov 40  }
 0x690   : > { %v3217_v46 = vpop.f32.mrf.mxu1 }
 0x695   : > { %v1243_v47 = vpop.f32.mrf.mxu1 }
 0x696   : > { %1418 = vrot.lane.b32.xlu1 %v1243_v47, %s4317_s24  ;;  %s4339_s24 = smov 104  }
 0x697   : > { %v3227_v48 = vpop.f32.mrf.mxu1 }
 0x699   : > { %v1409_v49 = vpop.f32.mrf.mxu1 }
 0x69a   : > { %1422 = vrot.lane.b32.xlu0 %v1409_v49, %s4316_s29  ;;  %s4340_s29 = smov 56  }
 0x69b   : > { %v3237_v50 = vpop.f32.mrf.mxu1 }
 0x701   : > { %v1415_v51 = vpop.permute.xlu0 %1414 }
 0x702   : > { %v1425_v53 = vsel %vm752_vm4, %v911_v40, %v1415_v51 }
 0x708   : > { %v1419_v52 = vpop.permute.xlu1 %1418 }
 0x709   : > { %v1427_v54 = vsel %vm1426_vm5, %v1425_v53, %v1419_v52 }
 0x70c   : > { %v1423_v55 = vpop.permute.xlu0 %1422 }
 0x70d   : > { %v1429_v56 = vsel %vm1428_vm6, %v1427_v54, %v1423_v55 }
 0x70e   : > { %3247 = vmatmul.mubr.msk.f32.vlgmr.msra.gmra.mxu0 %vm636_vm3, %v1429_v56 }
 0x70f   : > { %3292 = vmatprep.mubr.msk.f32.mxu0 %vm3574_vm0, %v3573_v2  ;;  %3261 = vmatpush3.msra.mxu0 %v1670_v17 }
 0x710   : > { %3262 = vmatprep.subr.mxu0 %v3573_v2 }
 0x711   : > { %3263 = vmatpush3.msra.mxu0 %v1669_v18  ;;  %v2999_v18 = vld [vmem:[%s4299_s15] ss:$0 sm:$0xff] }
 0x712   : > { %3264 = vmatprep.subr.mxu0 %v3573_v2 }
 0x713   : > { %3265 = vmatpush3.msra.mxu0 %v1668_v19 }
 0x714   : > { %3266 = vmatprep.subr.mxu0 %v3573_v2 }
 0x715   : > { %3267 = vmatpush3.msra.mxu0 %v1667_v20  ;;  %v3000_v20 = vld [vmem:[%s4300_s16] ss:$0 sm:$0xff] }
 0x716   : > { %3268 = vmatprep.subr.mxu0 %v3573_v2 }
 0x717   : > { %3269 = vmatpush3.msra.mxu0 %v1666_v21 }
 0x718   : > { %3270 = vmatprep.subr.mxu0 %v3573_v2 }
 0x719   : > { %3271 = vmatpush3.msra.mxu0 %v1665_v22 }
 0x71a   : > { %3272 = vmatprep.subr.mxu0 %v3573_v2 }
 0x71b   : > { %3273 = vmatpush3.msra.mxu0 %v1664_v23  ;;  %v3006_v23 = vld [vmem:[%s4290_s6 + $0x1] ss:$0 sm:$0xff] }
 0x71c   : > { %3274 = vmatprep.subr.mxu0 %v3573_v2 }
 0x71d   : > { %3275 = vmatpush3.msra.mxu0 %v1663_v24 }
 0x71e   : > { %3276 = vmatprep.subr.mxu0 %v3573_v2 }
 0x71f   : > { %3277 = vmatpush3.msra.mxu0 %v1662_v25 }
 0x720   : > { %3278 = vmatprep.subr.mxu0 %v3573_v2 }
 0x721   : > { %3279 = vmatpush3.msra.mxu0 %v1661_v26 }
 0x722   : > { %3280 = vmatprep.subr.mxu0 %v3573_v2 }
 0x723   : > { %3281 = vmatpush3.msra.mxu0 %v1660_v27 }
 0x724   : > { %3282 = vmatprep.subr.mxu0 %v3573_v2 }
 0x725   : > { %3283 = vmatpush3.msra.mxu0 %v1659_v28 }
 0x726   : > { %3284 = vmatprep.subr.mxu0 %v3573_v2 }
 0x727   : > { %3285 = vmatpush3.msra.mxu0 %v1658_v29 }
 0x728   : > { %3286 = vmatprep.subr.mxu0 %v3573_v2 }
 0x729   : > { %3287 = vmatpush3.msra.mxu0 %v1657_v30 }
 0x72a   : > { %3288 = vmatprep.subr.mxu0 %v3573_v2 }
 0x72b   : > { %3289 = vmatpush3.msra.mxu0 %v1656_v31 }
 0x72c   : > { %3290 = vmatprep.subr.mxu0 %v3573_v2 }
 0x72d   : > { %3291 = vmatpush3.msra.mxu0 %v1655_v32 }
 0x72e   : > { %3336 = vmatprep.subr.mxu0 %v3573_v2 }
 0x7ce   : > { %v1510_v58 = vpop.f32.mrf.mxu0 }
 0x7cf   : > { %v1511_v59 = vadd.f32 %v2992_v57, %v1510_v58 }
 0x7d0   : > { %v3248_v60 = vpop.f32.mrf.mxu0 }
 0x7d1   : > { %v1514_v61 = vadd.f32 %v1511_v59, %v3801_v37  ;;  %v1545_v37 = vld [vmem:[%s4295_s11 + $0x8] sm:$0xff] }
 0x7d2   : > { %3254 = vmatpush3.msra.mxu1 %v1545_v37 }
 0x7d3   : > { %v1517_v62 = vsel %vm636_vm3, %v1514_v61, 0.0  ;;  %3255 = vmatprep.subr.mxu1 %v3573_v2 }
 0x7d4   : > { %1518 = vadd.xlane.f32.xlu1 %v1517_v62  ;;  %3256 = vmatpush3.msra.mxu1 %v1544_v7 }
 0x7d5   : > { %3295 = vmatprep.subr.mxu1 %v3573_v2 }
 0x85d   : > { %v1519_v63 = vpop.xlane.xlu1 %1518 }
 0x85e   : > { %v1520_v0 = vmul.f32 0.03125, %v1519_v63  ;;  %v2998_v63 = vld [vmem:[%s4298_s14] ss:$0 sm:$0xff] }
 0x860   : > { %v1521_v1 = vsub.f32 %v1514_v61, %v1520_v0 }
 0x862   : > { %v1522_v3 = vmul.f32 %v1521_v1, %v1521_v1 }
 0x864   : > { %v1523_v4 = vsel %vm636_vm3, %v1522_v3, 0.0 }
 0x865   : > { %1524 = vadd.xlane.f32.xlu0 %v1523_v4 }
 0x8ee   : > { %v1525_v8 = vpop.xlane.xlu0 %1524 }
 0x8ef   : > { %v1526_v9 = vmul.f32 0.03125, %v1525_v8 }
 0x8f1   : > { %v1527_v10 = vadd.f32 1e-12, %v1526_v9 }
 0x8f3   : > { %3478 = vrsqrt.f32 %v1527_v10  ;;  %v3004_v10 = vld [vmem:[%s4289_s5 + $0x38] sm:$0xff] }
 0x900   : > { %v3479_v11 = vpop.eup %3478 }
 0x901   : > { %v1529_v13 = vmul.f32 %v3479_v11, %v1521_v1  ;;  %v3003_v11 = vld [vmem:[%s4289_s5 + $0x30] sm:$0xff] }
 0x903   : > { %v1536_v15 = vmul.f32 %v2994_v12, %v1529_v13  ;;  %v3002_v12 = vld [vmem:[%s4289_s5 + $0x28] sm:$0xff]  ;;  %v3001_v13 = vld [vmem:[%s4289_s5 + $0x20] sm:$0xff] }
 0x905   : > { %v3932_v16 = vadd.f32 %v2995_v14, %v1536_v15 }
 0x907   : > { %3258 = vmatmul.mubr.msk.f32.vlgmr.msra.gmra.mxu1 %vm636_vm3, %v3932_v16 }
 0x908   : > { %3303 = vmatprep.mubr.msk.f32.mxu1 %vm3574_vm0, %v3573_v2  ;;  %3296 = vmatpush3.msra.mxu1 %v3004_v10 }
 0x909   : > { %3297 = vmatprep.subr.mxu1 %v3573_v2 }
 0x90a   : > { %3298 = vmatpush3.msra.mxu1 %v3003_v11 }
 0x90b   : > { %3299 = vmatprep.subr.mxu1 %v3573_v2 }
 0x90c   : > { %3300 = vmatpush3.msra.mxu1 %v3002_v12 }
 0x90d   : > { %3301 = vmatprep.subr.mxu1 %v3573_v2 }
 0x90e   : > { %3302 = vmatpush3.msra.mxu1 %v3001_v13 }
 0x90f   : > { %3306 = vmatprep.subr.mxu1 %v3573_v2 }
 0x9c7   : > { %v1624_v34 = vpop.f32.mrf.mxu1 }
 0x9c8   : > { %v1625_v35 = vadd.f32 %v2996_v33, %v1624_v34 }
 0x9c9   : > { %v3259_v36 = vpop.f32.mrf.mxu1 }
 0x9ca   : > { %v1629_v38 = vmul.f32 0.70710677, %v1625_v35  ;;  %v1628_v60 = vmul.f32 0.5, %v1625_v35 }
 0x9cc   : > { %v1630_v39 = vand.u32 2147483647, %v1629_v38  ;;  %vm1650_vm7 = vcmp.ge.f32.partialorder %v1629_v38, 0.0 }
 0x9ce   : > { %v1631_v40 = vmul.f32 0.3275911, %v1630_v39  ;;  %v1644_v42 = vsub.f32 0.0, %v1630_v39 }
 0x9d0   : > { %v1632_v41 = vadd.f32 1.0, %v1631_v40  ;;  %v1645_v43 = vmul.f32 %v1644_v42, %v1630_v39 }
 0x9d2   : > { %3480 = vrcp.f32 %v1632_v41  ;;  %v1646_v46 = vmul.f32 1.442695, %v1645_v43 }
 0x9d4   : > { %3482 = vpow2.f32 %v1646_v46 }
 0x9df   : > { %v3481_v44 = vpop.eup %3480 }
 0x9e0   : > { %v1635_v45 = vmul.f32 1.0614054, %v3481_v44 }
 0x9e1   : > { %v3483_v55 = vpop.eup %3482 }
 0x9e2   : > { %v1636_v47 = vadd.f32 -1.4531521, %v1635_v45 }
 0x9e4   : > { %v1637_v48 = vmul.f32 %v3481_v44, %v1636_v47 }
 0x9e6   : > { %v1638_v49 = vadd.f32 1.4214138, %v1637_v48 }
 0x9e8   : > { %v1639_v50 = vmul.f32 %v3481_v44, %v1638_v49 }
 0x9ea   : > { %v1640_v51 = vadd.f32 -0.28449672, %v1639_v50 }
 0x9ec   : > { %v1641_v52 = vmul.f32 %v3481_v44, %v1640_v51 }
 0x9ee   : > { %v1642_v53 = vadd.f32 0.2548296, %v1641_v52 }
 0x9f0   : > { %v1643_v54 = vmul.f32 %v3481_v44, %v1642_v53 }
 0x9f2   : > { %v1648_v56 = vmul.f32 %v3483_v55, %v1643_v54 }
 0x9f4   : > { %v1649_v57 = vsub.f32 1.0, %v1648_v56 }
 0x9f6   : > { %v1651_v58 = vsub.f32 0.0, %v1649_v57 }
 0x9f8   : > { %v1652_v59 = vsel %vm1650_vm7, %v1649_v57, %v1651_v58 }
 0x9f9   : > { %v1653_v61 = vadd.f32 1.0, %v1652_v59 }
 0x9fb   : > { %v1654_v62 = vmul.f32 %v1653_v61, %v1628_v60 }
 0x9fd   : > { %3293 = vmatmul.mubr.f32.vlgmr.msra.gmra.mxu0 %v1654_v62 }
 0x9fe   : > { %3338 = vmatprep.mubr.msk.f32.mxu0 %vm3574_vm0, %v3573_v2 }
 0xabd   : > { %v1744_v0 = vpop.f32.mrf.mxu0 }
 0xabe   : > { %v1745_v1 = vadd.f32 %v2998_v63, %v1744_v0 }
 0xabf   : > { %v3294_v3 = vpop.f32.mrf.mxu0 }
 0xac0   : > { %v1748_v4 = vadd.f32 %v1745_v1, %v3932_v16 }
 0xac2   : > { %v1751_v5 = vsel %vm636_vm3, %v1748_v4, 0.0 }
 0xac3   : > { %1752 = vadd.xlane.f32.xlu0 %v1751_v5 }
 0xb4c   : > { %v1753_v6 = vpop.xlane.xlu0 %1752 }
 0xb4d   : > { %v1754_v37 = vmul.f32 0.03125, %v1753_v6 }
 0xb4f   : > { %v1755_v7 = vsub.f32 %v1748_v4, %v1754_v37 }
 0xb51   : > { %v1756_v8 = vmul.f32 %v1755_v7, %v1755_v7 }
 0xb53   : > { %v1757_v9 = vsel %vm636_vm3, %v1756_v8, 0.0 }
 0xb54   : > { %1758 = vadd.xlane.f32.xlu1 %v1757_v9 }
 0xbdd   : > { %v1759_v14 = vpop.xlane.xlu1 %1758 }
 0xbde   : > { %v1760_v15 = vmul.f32 0.03125, %v1759_v14 }
 0xbe0   : > { %v1761_v16 = vadd.f32 1e-12, %v1760_v15 }
 0xbe2   : > { %3484 = vrsqrt.f32 %v1761_v16 }
 0xbef   : > { %v3485_v17 = vpop.eup %3484 }
 0xbf0   : > { %v1763_v19 = vmul.f32 %v3485_v17, %v1755_v7 }
 0xbf2   : > { %v1770_v21 = vmul.f32 %v2999_v18, %v1763_v19 }
 0xbf4   : > { %v4035_v22 = vadd.f32 %v3000_v20, %v1770_v21 }
 0xbf6   : > { %3304 = vmatmul.mubr.msk.f32.vlgmr.msra.gmra.mxu1 %vm636_vm3, %v4035_v22 }
 0xbf7   : > { %3308 = vmatprep.mubr.msk.f32.mxu1 %vm3574_vm0, %v3573_v2 }
 0xcb6   : > { %v1860_v24 = vpop.f32.mrf.mxu1 }
 0xcb7   : > { %v4044_v25 = vadd.f32 %v3006_v23, %v1860_v24 }
 0xcb8   : > { %v3305_v26 = vpop.f32.mrf.mxu1 }
 0xcb9   : > { %1865 = vrot.lane.b32.xlu0 %v4044_v25, %s3576_s20  ;;  %s4336_s20 = smov 64  }
 0xcbd   : > { %2031 = vrot.lane.b32.xlu0 %v4044_v25, %s3577_s21  ;;  %s4337_s21 = smov 80  }
 0xcc1   : > { %2029 = vrot.lane.b32.xlu0 %v4044_v25, %s4335_s30  ;;  %s537_s30 = sand.u32 1, %s3562_s25  }
 0xd2b   : > { %v1866_v27 = vpop.permute.xlu0 %1865 }
 0xd2c   : > { %3307 = vmatpush3.xpose.msk.msra.mxu1 %vm752_vm4, %v1866_v27 }
 0xd2d   : > { %3311 = vmatprep.subr.mxu1 %v3573_v2 }
 0xd2f   : > { %3309 = vmatmul.mubr.msk.f32.vlgmr.msra.gmra.mxu1 %vm752_vm4, %v4044_v25  ;;  %v2032_v41 = vpop.permute.xlu0 %2031 }
 0xd30   : > { %3313 = vmatprep.mubr.msk.f32.mxu1 %vm3574_vm0, %v3573_v2 }
 0xd33   : > { %v2030_v43 = vpop.permute.xlu0 %2029 }
 0xdef   : > { %v1937_v28 = vpop.f32.mrf.mxu1 }
 0xdf0   : > { %v1941_v29 = vmul.f32 0.35355338, %v1937_v28 }
 0xdf1   : > { %v3310_v30 = vpop.f32.mrf.mxu1 }
 0xdf2   : > { %v1942_v31 = vsel %vm752_vm4, %v1941_v29, -inf  ;;  %v3021_v30 = vld [vmem:[%s4291_s7 + $0x28] sm:$0xff] }
 0xdf3   : > { %1943 = vmax.xlane.f32.xlu1 %v1942_v31  ;;  %v3020_v31 = vld [vmem:[%s4291_s7 + $0x20] sm:$0xff] }
 0xe7c   : > { %v1944_v32 = vpop.xlane.xlu1 %1943 }
 0xe7d   : > { %v1945_v33 = vsub.f32 %v1941_v29, %v1944_v32  ;;  %v3022_v29 = vld [vmem:[%s4291_s7 + $0x30] sm:$0xff] }
 0xe7f   : > { %v1946_v34 = vmul.f32 1.442695, %v1945_v33 }
 0xe81   : > { %3486 = vpow2.f32 %v1946_v34 }
 0xe8e   : > { %v3487_v35 = vpop.eup %3486 }
 0xe8f   : > { %v1948_v36 = vsel %vm752_vm4, %v3487_v35, 0.0 }
 0xe90   : > { %1949 = vadd.xlane.f32.xlu1 %v1948_v36 }
 0xea1   : > { %1953 = vrot.lane.b32.xlu1 %v4044_v25, %s4336_s20  ;;  %s2903_s20 = scalar_lea.sflag [#allocation3], %s537_s30 }
 0xf19   : > { %v1950_v38 = vpop.xlane.xlu1 %1949 }
 0xf1a   : > { %3488 = vrcp.f32 %v1950_v38 }
 0xf1d   : > { %v1954_v39 = vpop.permute.xlu1 %1953 }
 0xf1e   : > { %3312 = vmatpush3.msra.mxu1 %v1954_v39 }
 0xf1f   : > { %3316 = vmatprep.subr.mxu1 %v3573_v2 }
 0xf27   : > { %v3489_v40 = vpop.eup %3488 }
 0xf28   : > { %v1952_v42 = vmul.f32 %v3489_v40, %v3487_v35 }
 0xf2a   : > { %3314 = vmatmul.mubr.msk.f32.vlgmr.msra.gmra.mxu1 %vm752_vm4, %v1952_v42 }
 0xf2b   : > { %3317 = vmatpush3.xpose.msk.msra.mxu1 %vm752_vm4, %v2032_v41  ;;  %3318 = vmatprep.mubr.msk.f32.mxu1 %vm3574_vm0, %v3573_v2 }
 0xf2c   : > { %3321 = vmatprep.subr.mxu1 %v3573_v2 }
 0xf2e   : > { %3319 = vmatmul.mubr.msk.f32.vlgmr.msra.gmra.mxu1 %vm752_vm4, %v2030_v43  ;;  %v3025_v43 = vld [vmem:[%s4292_s8 + $0x1] ss:$0 sm:$0xff] }
 0xf2f   : > { %3323 = vmatprep.mubr.msk.f32.mxu1 %vm3574_vm0, %v3573_v2 }
 0xfea   : > { %v4071_v44 = vpop.f32.mrf.mxu1 }
 0xfec   : > { %v3315_v45 = vpop.f32.mrf.mxu1 }
 0xfee   : > { %v2103_v46 = vpop.f32.mrf.mxu1 }
 0xfef   : > { %v2107_v47 = vmul.f32 0.35355338, %v2103_v46 }
 0xff0   : > { %v3320_v48 = vpop.f32.mrf.mxu1 }
 0xff1   : > { %v2108_v49 = vsel %vm752_vm4, %v2107_v47, -inf }
 0xff2   : > { %2109 = vmax.xlane.f32.xlu1 %v2108_v49 }
0x1003   : > { %2197 = vrot.lane.b32.xlu1 %v4044_v25, %s4337_s21 }
0x1007   : > { %2195 = vrot.lane.b32.xlu1 %v4044_v25, %s4338_s26  ;;  %s3589_s26 = smov [#allocation2]  }
0x100b   : > { %2361 = vrot.lane.b32.xlu1 %v4044_v25, %s4339_s24  ;;  %s3514_s24 = sshll.u32 %s3589_s26, 4  ;;  %s3515_s24 = int_to_ptr.vmem [resolvable:$false] %s3514_s24 }
0x107b   : > { %v2110_v50 = vpop.xlane.xlu1 %2109 }
0x107c   : > { %v2111_v51 = vsub.f32 %v2107_v47, %v2110_v50 }
0x107e   : > { %v2112_v52 = vmul.f32 1.442695, %v2111_v51 }
0x107f   : > { %v2198_v55 = vpop.permute.xlu1 %2197 }
0x1080   : > { %3490 = vpow2.f32 %v2112_v52 }
0x1083   : > { %v2196_v58 = vpop.permute.xlu1 %2195 }
0x1087   : > { %v2362_v60 = vpop.permute.xlu1 %2361 }
0x108d   : > { %v3491_v53 = vpop.eup %3490 }
0x108e   : > { %v2114_v54 = vsel %vm752_vm4, %v3491_v53, 0.0 }
0x108f   : > { %2115 = vadd.xlane.f32.xlu0 %v2114_v54  ;;  %v3034_v54 = vld [vmem:[%s4295_s11 + $0x38] sm:$0xff] }
0x10a5   : > { %2119 = vrot.lane.b32.xlu0 %v4044_v25, %s4340_s29  ;;  %s3060_s29 = sshll.u32 %s3701_s28, 4  ;;  %s3516_s28 = scalar_lea.vmem %s3515_s24, 32 }
0x10a6   : > { %s2913_s2 = scalar_lea.hbm %s4301_s17, %s3060_s29 }
0x10a9   : > { %2363 = vrot.lane.b32.xlu0 %v4044_v25, %s4341_s0  ;;  %s538_s0 = scalar_lea.vmem [#allocation2], %s537_s30 }
0x1118   : > { %v2116_v56 = vpop.xlane.xlu0 %2115 }
0x1119   : > { %3492 = vrcp.f32 %v2116_v56  ;;  %v3031_v56 = vld [vmem:[%s4295_s11 + $0x20] sm:$0xff] }
0x111c   : > { %v2120_v57 = vpop.permute.xlu0 %2119 }
0x111d   : > { %3322 = vmatpush3.msra.mxu1 %v2120_v57 }
0x111e   : > { %3326 = vmatprep.subr.mxu1 %v3573_v2 }
0x1120   : > { %v2364_v59 = vpop.permute.xlu0 %2363 }
0x1121   : > { %3337 = vmatpush3.xpose.msk.msra.mxu0 %vm752_vm4, %v2364_v59 }
0x1122   : > { %3346 = vmatprep.subr.mxu0 %v3573_v2 }
0x1124   : > { %3339 = vmatmul.mubr.msk.f32.vlgmr.msra.gmra.mxu0 %vm752_vm4, %v2362_v60 }
0x1125   : > { %3354 = vmatprep.mubr.msk.f32.mxu0 %vm3574_vm0, %v3573_v2 }
0x1126   : > { %v3493_v61 = vpop.eup %3492 }
0x1127   : > { %v2118_v62 = vmul.f32 %v3493_v61, %v3491_v53  ;;  %v3029_v61 = vld [vmem:[%s4293_s9 + $0x1] ss:$0 sm:$0xff] }
0x1129   : > { %3324 = vmatmul.mubr.msk.f32.vlgmr.msra.gmra.mxu1 %vm752_vm4, %v2118_v62 }
0x112a   : > { %3327 = vmatpush3.xpose.msk.msra.mxu1 %vm752_vm4, %v2198_v55  ;;  %3328 = vmatprep.mubr.msk.f32.mxu1 %vm3574_vm0, %v3573_v2  ;;  %v3033_v55 = vld [vmem:[%s4295_s11 + $0x30] sm:$0xff] }
0x112b   : > { %3331 = vmatprep.subr.mxu1 %v3573_v2 }
0x112d   : > { %3329 = vmatmul.mubr.msk.f32.vlgmr.msra.gmra.mxu1 %vm752_vm4, %v2196_v58 }
0x112e   : > { %3333 = vmatprep.mubr.msk.f32.mxu1 %vm3574_vm0, %v3573_v2 }
0x11e4   : > { %v2435_v63 = vpop.f32.mrf.mxu0 }
0x11e5   : > { %v2439_v0 = vmul.f32 0.35355338, %v2435_v63  ;;  %v3030_v63 = vld [vmem:[%s4294_s10 + $0x1] ss:$0 sm:$0xff] }
0x11e6   : > { %v3340_v1 = vpop.f32.mrf.mxu0 }
0x11e7   : > { %v2440_v3 = vsel %vm752_vm4, %v2439_v0, -inf }
0x11e8   : > { %2441 = vmax.xlane.f32.xlu1 %v2440_v3  ;;  %v3053_v3 = vld [vmem:[%s4297_s13 + $0xf8] sm:$0xff] }
0x11e9   : > { %v2191_v4 = vpop.f32.mrf.mxu1 }
0x11eb   : > { %v3325_v5 = vpop.f32.mrf.mxu1 }
0x11ec   : > { %v3051_v5 = vld [vmem:[%s4297_s13 + $0xe8] sm:$0xff] }
0x11ed   : > { %v2269_v6 = vpop.f32.mrf.mxu1 }
0x11ee   : > { %v2273_v37 = vmul.f32 0.35355338, %v2269_v6  ;;  %v3050_v6 = vld [vmem:[%s4297_s13 + $0xe0] sm:$0xff] }
0x11ef   : > { %v3330_v7 = vpop.f32.mrf.mxu1 }
0x11f0   : > { %v2274_v8 = vsel %vm752_vm4, %v2273_v37, -inf  ;;  %v3048_v7 = vld [vmem:[%s4297_s13 + $0xd0] sm:$0xff] }
0x11f1   : > { %2275 = vmax.xlane.f32.xlu0 %v2274_v8  ;;  %v3047_v8 = vld [vmem:[%s4297_s13 + $0xc8] sm:$0xff] }
0x11f9   : > { %2285 = vrot.lane.b32.xlu1 %v4044_v25, %s4342_s18  ;;  %s2915_s18 = sshll.u32 %s538_s0, 4  ;;  %s2916_s18 = int_to_ptr.vmem [resolvable:$true] %s2915_s18 }
0x11fa   : > { %s3510_s21 = scalar_lea.vmem %s2916_s18, 16  ;;  %p3517_p0 = scmp.lt.s32.totalorder %s2916_s18, %s3515_s24 }
0x11fb   : > { %p3511_p11 = scmp.ne.s32.totalorder %s2916_s18, %s3510_s21  ;;  %p3518_p1 = scmp.lt.s32.totalorder %s3516_s28, %s3510_s21 }
0x11fd   : > { %2528 = vrot.lane.b32.xlu1 %v2191_v4, %s4343_s22  ;;  %s4345_s22 = smov 16   ;;  %v3052_v4 = vld [vmem:[%s4297_s13 + $0xf0] sm:$0xff]  ;;  %p3512_p12 = pnand %p3511_p11, %p3718_p5 }
0x11fe   : > { %p3519_p2 = por %p3518_p1, %p3517_p0 }
0x11ff   : > { %p3513_p13 = pneg %p3512_p12 }
0x1201   : > { %p3520_p3 = pnand %p3519_p2, %p3513_p13 }
0x1271   : > { %v2442_v9 = vpop.xlane.xlu1 %2441 }
0x1272   : > { %v2443_v10 = vsub.f32 %v2439_v0, %v2442_v9  ;;  %v3046_v9 = vld [vmem:[%s4297_s13 + $0xc0] sm:$0xff] }
0x1274   : > { %v2444_v11 = vmul.f32 1.442695, %v2443_v10  ;;  %v3045_v10 = vld [vmem:[%s4297_s13 + $0xb8] sm:$0xff] }
0x1275   : > { %v2286_v12 = vpop.permute.xlu1 %2285 }
0x1276   : > { %3494 = vpow2.f32 %v2444_v11  ;;  %3332 = vmatpush3.msra.mxu1 %v2286_v12  ;;  %v3044_v11 = vld [vmem:[%s4297_s13 + $0xb0] sm:$0xff]  ;;  %v3043_v12 = vld [vmem:[%s4297_s13 + $0xa8] sm:$0xff] }
0x1277   : > { %3341 = vmatprep.subr.mxu1 %v3573_v2 }
0x1279   : > { %v2529_v36 = vpop.permute.xlu1 %2528 }
0x127a   : > { %v2276_v13 = vpop.xlane.xlu0 %2275  ;;  %v2539_v39 = vsel %vm752_vm4, %v4071_v44, %v2529_v36 }
0x127b   : > { %v2277_v14 = vsub.f32 %v2273_v37, %v2276_v13  ;;  %v3049_v37 = vld [vmem:[%s4297_s13 + $0xd8] sm:$0xff]  ;;  %v3042_v13 = vld [vmem:[%s4297_s13 + $0xa0] sm:$0xff] }
0x127d   : > { %v2278_v15 = vmul.f32 1.442695, %v2277_v14  ;;  %v3041_v14 = vld [vmem:[%s4297_s13 + $0x98] sm:$0xff] }
0x127f   : > { %3496 = vpow2.f32 %v2278_v15  ;;  %v3040_v15 = vld [vmem:[%s4297_s13 + $0x90] sm:$0xff] }
0x1283   : > { %v3495_v16 = vpop.eup %3494 }
0x1284   : > { %v2446_v17 = vsel %vm752_vm4, %v3495_v16, 0.0 }
0x1285   : > { %2447 = vadd.xlane.f32.xlu0 %v2446_v17  ;;  %v3038_v17 = vld [vmem:[%s4297_s13 + $0x80] sm:$0xff] }
0x128c   : > { %v3497_v18 = vpop.eup %3496 }
0x128d   : > { %v2280_v19 = vsel %vm752_vm4, %v3497_v18, 0.0 }
0x128e   : > { %2281 = vadd.xlane.f32.xlu0 %v2280_v19 }
0x12a4   : > { %2451 = vrot.lane.b32.xlu0 %v4044_v25, %s4344_s19  ;;  %v3023_v25 = vld [vmem:[%s4291_s7 + $0x38] sm:$0xff]  ;;  %s4346_s19 = smov 24  }
0x12a5   : > { %3347 = vmatpush3.msra.mxu0 %v3023_v25 }
0x12a6   : > { %3348 = vmatprep.subr.mxu0 %v3573_v2 }
0x12a7   : > { %3349 = vmatpush3.msra.mxu0 %v3022_v29 }
0x12a8   : > { %3350 = vmatprep.subr.mxu0 %v3573_v2 }
0x12a9   : > { %3351 = vmatpush3.msra.mxu0 %v3021_v30 }
0x12aa   : > { %3352 = vmatprep.subr.mxu0 %v3573_v2 }
0x12ab   : > { %3353 = vmatpush3.msra.mxu0 %v3020_v31 }
0x12ac   : > { %3368 = vmatprep.subr.mxu0 %v3573_v2 }
0x130e   : > { %v2448_v20 = vpop.xlane.xlu0 %2447 }
0x1317   : > { %v2282_v21 = vpop.xlane.xlu0 %2281 }
0x1318   : > { %3498 = vrcp.f32 %v2282_v21 }
0x1319   : > { %3500 = vrcp.f32 %v2448_v20 }
0x131b   : > { %v2452_v27 = vpop.permute.xlu0 %2451 }
0x1325   : > { %v3499_v23 = vpop.eup %3498 }
0x1326   : > { %v2284_v24 = vmul.f32 %v3499_v23, %v3497_v18  ;;  %v3501_v26 = vpop.eup %3500  ;;  %v3036_v18 = vld [vmem:[%s4296_s12 + $0x1] ss:$0 sm:$0xff] }
0x1327   : > { %v2450_v28 = vmul.f32 %v3501_v26, %v3495_v16  ;;  %v3039_v16 = vld [vmem:[%s4297_s13 + $0x88] sm:$0xff] }
0x1328   : > { %3334 = vmatmul.mubr.msk.f32.vlgmr.msra.gmra.mxu1 %vm752_vm4, %v2284_v24 }
0x1329   : > { %3342 = vmatpush3.msra.mxu1 %v2452_v27  ;;  %3343 = vmatprep.mubr.msk.f32.mxu1 %vm3574_vm0, %v3573_v2 }
0x132a   : > { %3357 = vmatprep.subr.mxu1 %v3573_v2 }
0x132c   : > { %3344 = vmatmul.mubr.msk.f32.vlgmr.msra.gmra.mxu1 %vm752_vm4, %v2450_v28 }
0x132d   : > { %3365 = vmatprep.mubr.msk.f32.mxu1 %vm3574_vm0, %v3573_v2  ;;  %3358 = vmatpush3.msra.mxu1 %v3034_v54 }
0x132e   : > { %3359 = vmatprep.subr.mxu1 %v3573_v2 }
0x132f   : > { %3360 = vmatpush3.msra.mxu1 %v3033_v55 }
0x1330   : > { %3361 = vmatprep.subr.mxu1 %v3573_v2 }
0x13e8   : > { %v2357_v32 = vpop.f32.mrf.mxu1 }
0x13e9   : > { %2532 = vrot.lane.b32.xlu1 %v2357_v32, %s4345_s22 }
0x13ea   : > { %v3335_v33 = vpop.f32.mrf.mxu1 }
0x13ec   : > { %v2523_v34 = vpop.f32.mrf.mxu1 }
0x13ed   : > { %2536 = vrot.lane.b32.xlu0 %v2523_v34, %s4346_s19 }
0x13ee   : > { %v3345_v35 = vpop.f32.mrf.mxu1 }
0x145b   : > { %v2533_v38 = vpop.permute.xlu1 %2532 }
0x145c   : > { %v2540_v40 = vsel %vm1426_vm5, %v2539_v39, %v2533_v38 }
0x145f   : > { %v2537_v41 = vpop.permute.xlu0 %2536 }
0x1460   : > { %v2541_v42 = vsel %vm1428_vm6, %v2540_v40, %v2537_v41 }
0x1461   : > { %3355 = vmatmul.mubr.msk.f32.vlgmr.msra.gmra.mxu0 %vm636_vm3, %v2541_v42 }
0x1462   : > { %3400 = vmatprep.mubr.msk.f32.mxu0 %vm3574_vm0, %v3573_v2  ;;  %3369 = vmatpush3.msra.mxu0 %v3053_v3 }
0x1463   : > { %3370 = vmatprep.subr.mxu0 %v3573_v2 }
0x1464   : > { %3371 = vmatpush3.msra.mxu0 %v3052_v4 }
0x1465   : > { %3372 = vmatprep.subr.mxu0 %v3573_v2 }
0x1466   : > { %3373 = vmatpush3.msra.mxu0 %v3051_v5 }
0x1467   : > { %3374 = vmatprep.subr.mxu0 %v3573_v2 }
0x1468   : > { %3375 = vmatpush3.msra.mxu0 %v3050_v6 }
0x1469   : > { %3376 = vmatprep.subr.mxu0 %v3573_v2 }
0x146a   : > { %3377 = vmatpush3.msra.mxu0 %v3049_v37 }
0x146b   : > { %3378 = vmatprep.subr.mxu0 %v3573_v2 }
0x146c   : > { %3379 = vmatpush3.msra.mxu0 %v3048_v7 }
0x146d   : > { %3380 = vmatprep.subr.mxu0 %v3573_v2 }
0x146e   : > { %3381 = vmatpush3.msra.mxu0 %v3047_v8 }
0x146f   : > { %3382 = vmatprep.subr.mxu0 %v3573_v2 }
0x1470   : > { %3383 = vmatpush3.msra.mxu0 %v3046_v9 }
0x1471   : > { %3384 = vmatprep.subr.mxu0 %v3573_v2 }
0x1472   : > { %3385 = vmatpush3.msra.mxu0 %v3045_v10 }
0x1473   : > { %3386 = vmatprep.subr.mxu0 %v3573_v2 }
0x1474   : > { %3387 = vmatpush3.msra.mxu0 %v3044_v11 }
0x1475   : > { %3388 = vmatprep.subr.mxu0 %v3573_v2 }
0x1476   : > { %3389 = vmatpush3.msra.mxu0 %v3043_v12 }
0x1477   : > { %3390 = vmatprep.subr.mxu0 %v3573_v2 }
0x1478   : > { %3391 = vmatpush3.msra.mxu0 %v3042_v13 }
0x1479   : > { %3392 = vmatprep.subr.mxu0 %v3573_v2 }
0x147a   : > { %3393 = vmatpush3.msra.mxu0 %v3041_v14 }
0x147b   : > { %3394 = vmatprep.subr.mxu0 %v3573_v2 }
0x147c   : > { %3395 = vmatpush3.msra.mxu0 %v3040_v15 }
0x147d   : > { %3396 = vmatprep.subr.mxu0 %v3573_v2 }
0x147e   : > { %3397 = vmatpush3.msra.mxu0 %v3039_v16 }
0x147f   : > { %3398 = vmatprep.subr.mxu0 %v3573_v2 }
0x1480   : > { %3399 = vmatpush3.msra.mxu0 %v3038_v17 }
0x1521   : > { %v2624_v45 = vpop.f32.mrf.mxu0 }
0x1522   : > { %v2625_v46 = vadd.f32 %v3025_v43, %v2624_v45 }
0x1523   : > { %v3356_v47 = vpop.f32.mrf.mxu0 }
0x1524   : > { %v2628_v48 = vadd.f32 %v2625_v46, %v4035_v22  ;;  %v3032_v22 = vld [vmem:[%s4295_s11 + $0x28] sm:$0xff] }
0x1525   : > { %3362 = vmatpush3.msra.mxu1 %v3032_v22 }
0x1526   : > { %v2633_v44 = vsel %vm636_vm3, %v2628_v48, 0.0  ;;  %3363 = vmatprep.subr.mxu1 %v3573_v2 }
0x1527   : > { %2634 = vadd.xlane.f32.xlu1 %v2633_v44  ;;  %3364 = vmatpush3.msra.mxu1 %v3031_v56  ;;  %v3055_v44 = vld [vmem:[%s4298_s14 + $0x1] ss:$0 sm:$0xff] }
0x15b0   : > { %v2635_v49 = vpop.xlane.xlu1 %2634 }
0x15b1   : > { %v2636_v50 = vmul.f32 0.03125, %v2635_v49 }
0x15b3   : > { %v2637_v51 = vsub.f32 %v2628_v48, %v2636_v50 }
0x15b5   : > { %v2638_v52 = vmul.f32 %v2637_v51, %v2637_v51 }
0x15b7   : > { %v2639_v53 = vsel %vm636_vm3, %v2638_v52, 0.0 }
0x15b8   : > { %2640 = vadd.xlane.f32.xlu0 %v2639_v53 }
0x1641   : > { %v2641_v57 = vpop.xlane.xlu0 %2640 }
0x1642   : > { %v2642_v58 = vmul.f32 0.03125, %v2641_v57 }
0x1644   : > { %v2643_v59 = vadd.f32 1e-12, %v2642_v58 }
0x1646   : > { %3502 = vrsqrt.f32 %v2643_v59 }
0x1653   : > { %v3503_v60 = vpop.eup %3502 }
0x1654   : > { %v2645_v62 = vmul.f32 %v3503_v60, %v2637_v51 }
0x1656   : > { %v2652_v0 = vmul.f32 %v3029_v61, %v2645_v62  ;;  %v3058_v62 = vld [vmem:[%s4299_s15 + $0x1] ss:$0 sm:$0xff] }
0x1658   : > { %v4168_v1 = vadd.f32 %v3030_v63, %v2652_v0  ;;  %v3059_v0 = vld [vmem:[%s4300_s16 + $0x1] ss:$0 sm:$0xff] }
0x165a   : > { %3366 = vmatmul.mubr.msk.f32.vlgmr.msra.gmra.mxu1 %vm636_vm3, %v4168_v1 }
0x171a   : > { %v2742_v19 = vpop.f32.mrf.mxu1 }
0x171b   : > { %v2743_v20 = vadd.f32 %v3036_v18, %v2742_v19 }
0x171c   : > { %v3367_v21 = vpop.f32.mrf.mxu1 }
0x171d   : > { %v2747_v23 = vmul.f32 0.70710677, %v2743_v20  ;;  %v2746_v46 = vmul.f32 0.5, %v2743_v20 }
0x171f   : > { %v2748_v24 = vand.u32 2147483647, %v2747_v23  ;;  %vm2768_vm8 = vcmp.ge.f32.partialorder %v2747_v23, 0.0 }
0x1721   : > { %v2749_v26 = vmul.f32 0.3275911, %v2748_v24  ;;  %v2762_v28 = vsub.f32 0.0, %v2748_v24 }
0x1723   : > { %v2750_v27 = vadd.f32 1.0, %v2749_v26  ;;  %v2763_v25 = vmul.f32 %v2762_v28, %v2748_v24 }
0x1725   : > { %3504 = vrcp.f32 %v2750_v27  ;;  %v2764_v31 = vmul.f32 1.442695, %v2763_v25 }
0x1727   : > { %3506 = vpow2.f32 %v2764_v31 }
0x1732   : > { %v3505_v29 = vpop.eup %3504 }
0x1733   : > { %v2753_v30 = vmul.f32 1.0614054, %v3505_v29 }
0x1734   : > { %v3507_v40 = vpop.eup %3506 }
0x1735   : > { %v2754_v32 = vadd.f32 -1.4531521, %v2753_v30 }
0x1737   : > { %v2755_v2 = vmul.f32 %v3505_v29, %v2754_v32 }
0x1739   : > { %v2756_v33 = vadd.f32 1.4214138, %v2755_v2 }
0x173b   : > { %v2757_v34 = vmul.f32 %v3505_v29, %v2756_v33 }
0x173d   : > { %v2758_v35 = vadd.f32 -0.28449672, %v2757_v34 }
0x173f   : > { %v2759_v36 = vmul.f32 %v3505_v29, %v2758_v35 }
0x1741   : > { %v2760_v38 = vadd.f32 0.2548296, %v2759_v36 }
0x1743   : > { %v2761_v39 = vmul.f32 %v3505_v29, %v2760_v38 }
0x1745   : > { %v2766_v41 = vmul.f32 %v3507_v40, %v2761_v39 }
0x1747   : > { %v2767_v42 = vsub.f32 1.0, %v2766_v41 }
0x1749   : > { %v2769_v43 = vsub.f32 0.0, %v2767_v42 }
0x174b   : > { %v2770_v45 = vsel %vm2768_vm8, %v2767_v42, %v2769_v43 }
0x174c   : > { %v2771_v47 = vadd.f32 1.0, %v2770_v45 }
0x174e   : > { %v2772_v48 = vmul.f32 %v2771_v47, %v2746_v46 }
0x1750   : > { %3401 = vmatmul.mubr.f32.vlgmr.msra.gmra.mxu0 %v2772_v48 }
0x1810   : > { %v2864_v49 = vpop.f32.mrf.mxu0 }
0x1811   : > { %v2865_v50 = vadd.f32 %v3055_v44, %v2864_v49 }
0x1812   : > { %v3402_v51 = vpop.f32.mrf.mxu0 }
0x1813   : > { %v2868_v52 = vadd.f32 %v2865_v50, %v4168_v1 }
0x1815   : > { %v2873_v53 = vsel %vm636_vm3, %v2868_v52, 0.0 }
0x1816   : > { %2874 = vadd.xlane.f32.xlu0 %v2873_v53 }
0x189f   : > { %v2875_v54 = vpop.xlane.xlu0 %2874 }
0x18a0   : > { %v2876_v55 = vmul.f32 0.03125, %v2875_v54 }
0x18a2   : > { %v2877_v22 = vsub.f32 %v2868_v52, %v2876_v55 }
0x18a4   : > { %v2878_v56 = vmul.f32 %v2877_v22, %v2877_v22 }
0x18a6   : > { %v2879_v57 = vsel %vm636_vm3, %v2878_v56, 0.0 }
0x18a7   : > { %2880 = vadd.xlane.f32.xlu1 %v2879_v57 }
0x1930   : > { %v2881_v58 = vpop.xlane.xlu1 %2880 }
0x1931   : > { %v2882_v59 = vmul.f32 0.03125, %v2881_v58 }
0x1933   : > { %v2883_v60 = vadd.f32 1e-12, %v2882_v59 }
0x1935   : > { %3508 = vrsqrt.f32 %v2883_v60 }
0x1942   : > { %v3509_v61 = vpop.eup %3508 }
0x1943   : > { %v2885_v63 = vmul.f32 %v3509_v61, %v2877_v22 }
0x1945   : > { %v2892_v1 = vmul.f32 %v3058_v62, %v2885_v63 }
0x1947   : > { %v2899_v3 = vadd.f32 %v3059_v0, %v2892_v1 }
0x1949   : > { %2901 = vst.msk [vmem:[%s538_s0] sm:$0x1] %vm2900_vm9, %v2899_v3 }
0x194a   : > { %3523 = shalt.err (!%p3520_p3)
}
0x194b   : > { %s3524_s3 = scalar_lea.hbm %s2913_s2, 16  ;;  %s3528_s0 = scalar_lea.hbm %s4301_s17, 32 }
0x194c   : > { %p3525_p4 = scmp.ne.s32.totalorder %s2913_s2, %s3524_s3  ;;  %p3529_p9 = scmp.lt.s32.totalorder %s2913_s2, %s4301_s17 }
0x194d   : > { %p3530_p10 = scmp.lt.s32.totalorder %s3528_s0, %s3524_s3 }
0x194e   : > { %p3526_p7 = pnand %p3525_p4, %p3718_p5 }
0x194f   : > { %p3531_p11 = por %p3530_p10, %p3529_p9 }
0x1950   : > { %p3527_p8 = pneg %p3526_p7 }
0x1952   : > { %p3532_p12 = pnand %p3531_p11, %p3527_p8 }
0x1954   : > { %3535 = shalt.err (!%p3532_p12)
}
0x1955   : > { %3403 = dma.vmem_to_hbm [thread:$0]  (%p3718_p5), %s2916_s18, 16, %s2913_s2, %s2903_s20  }
0x1956 PF: > { %s4347_s21 = sld [smem:[#allocation5_spill]]  ;;  %p3409_p13 = scmp.ge.s32.totalorder %s3570_s27, 2 }
0x1958   : > { %p3406_p0 = pnand %p3409_p13, %p3722_p6 }
0x195a   : > { %p3407_p1 = pneg %p3406_p0 }
0x195c   : > { %s2927_s24 = sand.u32 1, %s4347_s21  }
0x195d   : > { %s2928_s28 = scalar_lea.sflag [#allocation3], %s2927_s24 }
0x195e   : > { %3553 = dma.done.wait (%p3407_p1), %s2928_s28, 16  }
0x195f   : > { %3555 = vsyncadd (%p3407_p1), %s2928_s28, 4294967280  ;;  %s4349_s27 = sld [smem:[#allocation7_spill]]  ;;  %s4352_s24 = smov %s3562_s25 }
0x1960   : > { %s4350_s3 = sld [smem:[#allocation6_spill]] }
0x1961   : > { %s4351_s26 = sld [smem:[#allocation8_spill]] }
0x1965   : > { %p27_p2 = scmp.ge.s32.totalorder %s4349_s27, 4  }
0x1966   : > { %s4353_s25 = smov %s4350_s3 }
0x1967   :  { %29 = sbr.rel (!%p27_p2) target bundleno = 8 (0x8), region = 135 }
0x196c   :  { %2932 = vsyncpa [#allocation3], 1 }
0x196d   :  { %2934 = vsyncpa [#allocation3 + $0x1], 1 }

</bundles_post_ra>
